<compile_context>
chip_gen: v5e
topology: v5e:2x2
jax: 0.10.0
libtpu: 0.0.40
codegen_flags: <defaults>
</compile_context>

<pallas_src>
import math
import jax
import jax.numpy as jnp
from jax.experimental import pallas as pl
from jax.experimental.pallas import tpu as pltpu

# ---------------- small synthetic BERT config ----------------
VOCAB = 100
TYPE_VOCAB = 2
MAX_POS = 16
B = 2            # batch
S = 8            # sequence length
H = 32           # hidden_dim
NUM_HEADS = 4
DH = H // NUM_HEADS
FFN = 64         # intermediate size
NUM_LAYERS = 2
NUM_CLASSES = 3
LN_EPS = 1e-12

# order of the weight arrays fed to the fused kernel (after emb + mask)
WEIGHT_ORDER = ('emb_ln_g', 'emb_ln_b',
                'WQH', 'BQH', 'WKH', 'BKH', 'WVH', 'BVH',
                'WOH', 'BO', 'LN1G', 'LN1B',
                'W1', 'B1', 'W2', 'B2', 'LN2G', 'LN2B',
                'out_w', 'out_b')


# ---------------- in-kernel helpers (f32 VPU math) ----------------
def _layernorm(x, gamma, beta):
    mean = jnp.mean(x, axis=-1, keepdims=True)
    var = jnp.mean((x - mean) ** 2, axis=-1, keepdims=True)
    inv = jax.lax.rsqrt(var + LN_EPS)
    return (x - mean) * inv * gamma + beta


def _gelu(x):
    # TODO(synk): HF BERT uses exact erf-GELU; tanh approximation used here (EUP-friendly).
    return 0.5 * x * (1.0 + jnp.tanh(0.7978845608028654 * (x + 0.044715 * x * x * x)))


# ---------------- fused Pallas kernel (whole forward per batch element) ----------------
def fused_bert_kernel(emb_ref, mask_ref,
                      eg_ref, eb_ref,
                      wqh_ref, bqh_ref, wkh_ref, bkh_ref, wvh_ref, bvh_ref,
                      woh_ref, bo_ref, ln1g_ref, ln1b_ref,
                      w1_ref, b1_ref, w2_ref, b2_ref, ln2g_ref, ln2b_ref,
                      ow_ref, ob_ref,
                      hid_ref, logits_ref):
    # embedding LayerNorm
    x = _layernorm(emb_ref[0], eg_ref[...], eb_ref[...])          # (S, H) f32
    hid_ref[0, 0] = x

    mask_bias = (1.0 - mask_ref[0]) * (-1e9)                      # (1, S) -> broadcast over heads & query rows
    scale = 1.0 / math.sqrt(DH)

    for l in range(NUM_LAYERS):                                    # static unroll; weights resident in VMEM
        xb = x.astype(jnp.bfloat16)
        xh = jnp.broadcast_to(xb, (NUM_HEADS, S, H))               # head-batched operand (leading batch dim)

        # Q/K/V projections, head-batched: (NH,S,H) @ (NH,H,DH) -> (NH,S,DH), f32 accum
        q = jnp.einsum('hsk,hkd->hsd', xh, wqh_ref[l],
                       preferred_element_type=jnp.float32) + bqh_ref[l]
        k = jnp.einsum('hsk,hkd->hsd', xh, wkh_ref[l],
                       preferred_element_type=jnp.float32) + bkh_ref[l]
        v = jnp.einsum('hsk,hkd->hsd', xh, wvh_ref[l],
                       preferred_element_type=jnp.float32) + bvh_ref[l]

        # attention scores + masked softmax (f32)
        qb = (q * scale).astype(jnp.bfloat16)
        kb = k.astype(jnp.bfloat16)
        scores = jnp.einsum('hqd,hkd->hqk', qb, kb,
                            preferred_element_type=jnp.float32)   # (NH, S, S)
        scores = scores + mask_bias
        scores = scores - jnp.max(scores, axis=-1, keepdims=True)
        p = jnp.exp(scores)
        p = p * pl.reciprocal(jnp.sum(p, axis=-1, keepdims=True), approx=True)

        # context + output projection, head-batched; sum over heads is a cheap vreg add
        ctx = jnp.einsum('hqk,hkd->hqd', p.astype(jnp.bfloat16), v.astype(jnp.bfloat16),
                         preferred_element_type=jnp.float32)      # (NH, S, DH)
        per_head = jnp.einsum('hsd,hdo->hso', ctx.astype(jnp.bfloat16), woh_ref[l],
                              preferred_element_type=jnp.float32)  # (NH, S, H)
        attn_out = jnp.sum(per_head, axis=0) + bo_ref[l]           # (S, H)

        x1 = _layernorm(x + attn_out, ln1g_ref[l], ln1b_ref[l])

        # feed-forward
        hmid = _gelu(jnp.dot(x1.astype(jnp.bfloat16), w1_ref[l],
                             preferred_element_type=jnp.float32) + b1_ref[l])
        ffn_out = jnp.dot(hmid.astype(jnp.bfloat16), w2_ref[l],
                          preferred_element_type=jnp.float32) + b2_ref[l]
        x = _layernorm(x1 + ffn_out, ln2g_ref[l], ln2b_ref[l])
        hid_ref[0, l + 1] = x

    # pooled token ([CLS]) + classifier, fused into the same kernel
    pooled = x[0:1, :]                                             # (1, H)
    logits_ref[0] = (jnp.dot(pooled.astype(jnp.bfloat16), ow_ref[...],
                             preferred_element_type=jnp.float32) + ob_ref[...])


# ---------------- wrapper ----------------
def fused_bert(emb, mask3, params):
    weights = [params[name] for name in WEIGHT_ORDER]
    in_specs = [
        pl.BlockSpec((1, S, H), lambda b: (b, 0, 0)),              # embeddings, per batch element
        pl.BlockSpec((1, 1, S), lambda b: (b, 0, 0)),              # attention mask, per batch element
    ] + [pl.BlockSpec(w.shape, lambda b, n=w.ndim: (0,) * n) for w in weights]

    out_shapes = (
        jax.ShapeDtypeStruct((B, NUM_LAYERS + 1, S, H), jnp.float32),   # all hidden states
        jax.ShapeDtypeStruct((B, 1, NUM_CLASSES), jnp.float32),         # classifier logits
    )
    out_specs = (
        pl.BlockSpec((1, NUM_LAYERS + 1, S, H), lambda b: (b, 0, 0, 0)),
        pl.BlockSpec((1, 1, NUM_CLASSES), lambda b: (b, 0, 0)),
    )
    return pl.pallas_call(
        fused_bert_kernel,
        out_shape=out_shapes,
        grid=(B,),
        in_specs=in_specs,
        out_specs=out_specs,
        compiler_params=pltpu.CompilerParams(dimension_semantics=("parallel",)),
    )(emb, mask3, *weights)


# ---------------- parameters (synthetic, head-split + layer-stacked for the kernel) ----------------
def init_params(key):
    k_word, k_pos, k_type, k_out, k_layers = jax.random.split(key, 5)

    def dense(k, shape):
        return jax.random.normal(k, shape, jnp.float32) * 0.02

    layer_keys = jax.random.split(k_layers, NUM_LAYERS)
    wq_l, wk_l, wv_l, wo_l, w1_l, w2_l = [], [], [], [], [], []
    for lk in layer_keys:
        k0, k1, k2, k3, k4, k5 = jax.random.split(lk, 6)
        wq_l.append(dense(k0, (H, H)))
        wk_l.append(dense(k1, (H, H)))
        wv_l.append(dense(k2, (H, H)))
        wo_l.append(dense(k3, (H, H)))
        w1_l.append(dense(k4, (H, FFN)))
        w2_l.append(dense(k5, (FFN, H)))

    def split_heads_in(w):       # (H, H) -> (NH, H, DH): output columns split per head
        return w.reshape(H, NUM_HEADS, DH).transpose(1, 0, 2)

    def split_heads_out(w):      # (H, H) -> (NH, DH, H): concatenated-ctx input rows split per head
        return w.reshape(NUM_HEADS, DH, H)

    bf16 = jnp.bfloat16
    params = {
        'word_emb': dense(k_word, (VOCAB, H)),
        'pos_emb': dense(k_pos, (MAX_POS, H)),
        'type_emb': dense(k_type, (TYPE_VOCAB, H)),
        'emb_ln_g': jnp.ones((1, H), jnp.float32),
        'emb_ln_b': jnp.zeros((1, H), jnp.float32),
        # attention projections: head-split, layer-stacked, bf16 MXU operands
        'WQH': jnp.stack([split_heads_in(w) for w in wq_l]).astype(bf16),   # (L, NH, H, DH)
        'BQH': jnp.zeros((NUM_LAYERS, NUM_HEADS, 1, DH), jnp.float32),
        'WKH': jnp.stack([split_heads_in(w) for w in wk_l]).astype(bf16),
        'BKH': jnp.zeros((NUM_LAYERS, NUM_HEADS, 1, DH), jnp.float32),
        'WVH': jnp.stack([split_heads_in(w) for w in wv_l]).astype(bf16),
        'BVH': jnp.zeros((NUM_LAYERS, NUM_HEADS, 1, DH), jnp.float32),
        'WOH': jnp.stack([split_heads_out(w) for w in wo_l]).astype(bf16),  # (L, NH, DH, H)
        'BO': jnp.zeros((NUM_LAYERS, 1, H), jnp.float32),
        'LN1G': jnp.ones((NUM_LAYERS, 1, H), jnp.float32),
        'LN1B': jnp.zeros((NUM_LAYERS, 1, H), jnp.float32),
        'W1': jnp.stack(w1_l).astype(bf16),                                 # (L, H, FFN)
        'B1': jnp.zeros((NUM_LAYERS, 1, FFN), jnp.float32),
        'W2': jnp.stack(w2_l).astype(bf16),                                 # (L, FFN, H)
        'B2': jnp.zeros((NUM_LAYERS, 1, H), jnp.float32),
        'LN2G': jnp.ones((NUM_LAYERS, 1, H), jnp.float32),
        'LN2B': jnp.zeros((NUM_LAYERS, 1, H), jnp.float32),
        'out_w': dense(k_out, (H, NUM_CLASSES)).astype(bf16),               # pre-transposed (in, out)
        'out_b': jnp.zeros((1, NUM_CLASSES), jnp.float32),
    }
    return params


# ---------------- full forward (matches Bert_Model.forward) ----------------
def bert_model_forward(params, input_ids, attention_mask, token_type_ids):
    # Embedding lookups (gather glue in plain JAX); everything else in the fused Pallas kernel.
    pos_ids = jnp.arange(S)
    emb = (params['word_emb'][input_ids]
           + params['pos_emb'][pos_ids][None, :, :]
           + params['type_emb'][token_type_ids])
    mask3 = attention_mask.astype(jnp.float32).reshape(B, 1, S)

    hid, logits3 = fused_bert(emb, mask3, params)

    hidden_states = tuple(hid[:, i] for i in range(NUM_LAYERS + 1))   # bert_output[-1] tuple
    output = logits3.reshape(B, NUM_CLASSES)                          # Linear(pooled [CLS])
    return output, hidden_states


bert_model_forward_jit = jax.jit(bert_model_forward)


if __name__ == "__main__":
    key = jax.random.PRNGKey(0)
    pkey, ikey = jax.random.split(key)
    params = init_params(pkey)

    input_ids = jax.random.randint(ikey, (B, S), 0, VOCAB, dtype=jnp.int32)
    attention_mask = jnp.ones((B, S), jnp.int32).at[1, -2:].set(0)   # pad last 2 tokens of ex. 1
    token_type_ids = jnp.zeros((B, S), jnp.int32)

    logits, all_hidden = bert_model_forward_jit(params, input_ids, attention_mask, token_type_ids)
    jax.block_until_ready(logits)
    for hs in all_hidden:
        jax.block_until_ready(hs)

    assert logits.shape == (B, NUM_CLASSES)
    assert len(all_hidden) == NUM_LAYERS + 1
    assert all(hs.shape == (B, S, H) for hs in all_hidden)
    assert bool(jnp.all(jnp.isfinite(logits)))
    print("KERNEL_OK")
</pallas_src>

<mosaic_0001>
module attributes {stable_mosaic.version = 11 : i64} {
  func.func @fused_bert_kernel(%arg0: i32, %arg1: memref<1x8x32xf32, #tpu.memory_space<vmem>>, %arg2: memref<1x1x8xf32, #tpu.memory_space<vmem>>, %arg3: memref<1x32xf32, #tpu.memory_space<vmem>>, %arg4: memref<1x32xf32, #tpu.memory_space<vmem>>, %arg5: memref<2x4x32x8xbf16, #tpu.memory_space<vmem>>, %arg6: memref<2x4x1x8xf32, #tpu.memory_space<vmem>>, %arg7: memref<2x4x32x8xbf16, #tpu.memory_space<vmem>>, %arg8: memref<2x4x1x8xf32, #tpu.memory_space<vmem>>, %arg9: memref<2x4x32x8xbf16, #tpu.memory_space<vmem>>, %arg10: memref<2x4x1x8xf32, #tpu.memory_space<vmem>>, %arg11: memref<2x4x8x32xbf16, #tpu.memory_space<vmem>>, %arg12: memref<2x1x32xf32, #tpu.memory_space<vmem>>, %arg13: memref<2x1x32xf32, #tpu.memory_space<vmem>>, %arg14: memref<2x1x32xf32, #tpu.memory_space<vmem>>, %arg15: memref<2x32x64xbf16, #tpu.memory_space<vmem>>, %arg16: memref<2x1x64xf32, #tpu.memory_space<vmem>>, %arg17: memref<2x64x32xbf16, #tpu.memory_space<vmem>>, %arg18: memref<2x1x32xf32, #tpu.memory_space<vmem>>, %arg19: memref<2x1x32xf32, #tpu.memory_space<vmem>>, %arg20: memref<2x1x32xf32, #tpu.memory_space<vmem>>, %arg21: memref<32x3xbf16, #tpu.memory_space<vmem>>, %arg22: memref<1x3xf32, #tpu.memory_space<vmem>>, %arg23: memref<1x3x8x32xf32, #tpu.memory_space<vmem>>, %arg24: memref<1x1x3xf32, #tpu.memory_space<vmem>>) attributes {dimension_semantics = [#tpu.dimension_semantics<parallel>], iteration_bounds = array<i64: 2>, scalar_prefetch = 0 : i64, scratch_operands = 0 : i64, tpu.core_type = #tpu.core_type<tc>, window_params = [{transform_indices = @transform_0, window_bounds = array<i64: 1, 8, 32>}, {transform_indices = @transform_1, window_bounds = array<i64: 1, 1, 8>}, {pipeline_mode = #tpu.pipeline_mode<synchronous>, transform_indices = @transform_2, window_bounds = array<i64: 1, 32>}, {pipeline_mode = #tpu.pipeline_mode<synchronous>, transform_indices = @transform_3, window_bounds = array<i64: 1, 32>}, {pipeline_mode = #tpu.pipeline_mode<synchronous>, transform_indices = @transform_4, window_bounds = array<i64: 2, 4, 32, 8>}, {pipeline_mode = #tpu.pipeline_mode<synchronous>, transform_indices = @transform_5, window_bounds = array<i64: 2, 4, 1, 8>}, {pipeline_mode = #tpu.pipeline_mode<synchronous>, transform_indices = @transform_6, window_bounds = array<i64: 2, 4, 32, 8>}, {pipeline_mode = #tpu.pipeline_mode<synchronous>, transform_indices = @transform_7, window_bounds = array<i64: 2, 4, 1, 8>}, {pipeline_mode = #tpu.pipeline_mode<synchronous>, transform_indices = @transform_8, window_bounds = array<i64: 2, 4, 32, 8>}, {pipeline_mode = #tpu.pipeline_mode<synchronous>, transform_indices = @transform_9, window_bounds = array<i64: 2, 4, 1, 8>}, {pipeline_mode = #tpu.pipeline_mode<synchronous>, transform_indices = @transform_10, window_bounds = array<i64: 2, 4, 8, 32>}, {pipeline_mode = #tpu.pipeline_mode<synchronous>, transform_indices = @transform_11, window_bounds = array<i64: 2, 1, 32>}, {pipeline_mode = #tpu.pipeline_mode<synchronous>, transform_indices = @transform_12, window_bounds = array<i64: 2, 1, 32>}, {pipeline_mode = #tpu.pipeline_mode<synchronous>, transform_indices = @transform_13, window_bounds = array<i64: 2, 1, 32>}, {pipeline_mode = #tpu.pipeline_mode<synchronous>, transform_indices = @transform_14, window_bounds = array<i64: 2, 32, 64>}, {pipeline_mode = #tpu.pipeline_mode<synchronous>, transform_indices = @transform_15, window_bounds = array<i64: 2, 1, 64>}, {pipeline_mode = #tpu.pipeline_mode<synchronous>, transform_indices = @transform_16, window_bounds = array<i64: 2, 64, 32>}, {pipeline_mode = #tpu.pipeline_mode<synchronous>, transform_indices = @transform_17, window_bounds = array<i64: 2, 1, 32>}, {pipeline_mode = #tpu.pipeline_mode<synchronous>, transform_indices = @transform_18, window_bounds = array<i64: 2, 1, 32>}, {pipeline_mode = #tpu.pipeline_mode<synchronous>, transform_indices = @transform_19, window_bounds = array<i64: 2, 1, 32>}, {pipeline_mode = #tpu.pipeline_mode<synchronous>, transform_indices = @transform_20, window_bounds = array<i64: 32, 3>}, {pipeline_mode = #tpu.pipeline_mode<synchronous>, transform_indices = @transform_21, window_bounds = array<i64: 1, 3>}, {transform_indices = @transform_22, window_bounds = array<i64: 1, 3, 8, 32>}, {transform_indices = @transform_23, window_bounds = array<i64: 1, 1, 3>}]} {
    %c0 = arith.constant 0 : index
    %c0_0 = arith.constant 0 : index
    %c0_1 = arith.constant 0 : index
    %0 = vector.load %arg1[%c0, %c0_0, %c0_1] : memref<1x8x32xf32, #tpu.memory_space<vmem>>, vector<1x8x32xf32>
    %1 = vector.shape_cast %0 : vector<1x8x32xf32> to vector<8x32xf32>
    %c0_2 = arith.constant 0 : index
    %c0_3 = arith.constant 0 : index
    %2 = vector.load %arg3[%c0_2, %c0_3] : memref<1x32xf32, #tpu.memory_space<vmem>>, vector<1x32xf32>
    %c0_4 = arith.constant 0 : index
    %c0_5 = arith.constant 0 : index
    %3 = vector.load %arg4[%c0_4, %c0_5] : memref<1x32xf32, #tpu.memory_space<vmem>>, vector<1x32xf32>
    %cst = arith.constant dense<0.000000e+00> : vector<8xf32>
    %4 = vector.multi_reduction <add>, %1, %cst [1] : vector<8x32xf32> to vector<8xf32>
    %5 = vector.shape_cast %4 : vector<8xf32> to vector<8x1xf32>
    %cst_6 = arith.constant 3.200000e+01 : f32
    %6 = vector.broadcast %cst_6 : f32 to vector<8x1xf32>
    %7 = arith.divf %5, %6 : vector<8x1xf32>
    %8 = vector.broadcast %7 : vector<8x1xf32> to vector<8x32xf32>
    %9 = arith.subf %1, %8 : vector<8x32xf32>
    %10 = arith.mulf %9, %9 : vector<8x32xf32>
    %cst_7 = arith.constant dense<0.000000e+00> : vector<8xf32>
    %11 = vector.multi_reduction <add>, %10, %cst_7 [1] : vector<8x32xf32> to vector<8xf32>
    %12 = vector.shape_cast %11 : vector<8xf32> to vector<8x1xf32>
    %cst_8 = arith.constant 3.200000e+01 : f32
    %13 = vector.broadcast %cst_8 : f32 to vector<8x1xf32>
    %14 = arith.divf %12, %13 : vector<8x1xf32>
    %cst_9 = arith.constant 9.99999996E-13 : f32
    %15 = vector.broadcast %cst_9 : f32 to vector<8x1xf32>
    %16 = arith.addf %14, %15 : vector<8x1xf32>
    %17 = math.rsqrt %16 : vector<8x1xf32>
    %18 = vector.broadcast %7 : vector<8x1xf32> to vector<8x32xf32>
    %19 = arith.subf %1, %18 : vector<8x32xf32>
    %20 = vector.broadcast %17 : vector<8x1xf32> to vector<8x32xf32>
    %21 = arith.mulf %19, %20 : vector<8x32xf32>
    %22 = vector.broadcast %2 : vector<1x32xf32> to vector<8x32xf32>
    %23 = arith.mulf %21, %22 : vector<8x32xf32>
    %24 = vector.broadcast %3 : vector<1x32xf32> to vector<8x32xf32>
    %25 = arith.addf %23, %24 : vector<8x32xf32>
    %c0_10 = arith.constant 0 : index
    %c0_11 = arith.constant 0 : index
    %c0_12 = arith.constant 0 : index
    %c0_13 = arith.constant 0 : index
    %26 = vector.load %arg23[%c0_10, %c0_11, %c0_12, %c0_13] : memref<1x3x8x32xf32, #tpu.memory_space<vmem>>, vector<1x1x8x32xf32>
    %27 = vector.shape_cast %26 : vector<1x1x8x32xf32> to vector<8x32xf32>
    %28 = vector.shape_cast %25 : vector<8x32xf32> to vector<1x1x8x32xf32>
    tpu.vector_store %arg23[%c0_10, %c0_11, %c0_12, %c0_13], %28 {strides = array<i32>} : memref<1x3x8x32xf32, #tpu.memory_space<vmem>>, vector<1x1x8x32xf32>,
    %c0_14 = arith.constant 0 : index
    %c0_15 = arith.constant 0 : index
    %c0_16 = arith.constant 0 : index
    %29 = vector.load %arg2[%c0_14, %c0_15, %c0_16] : memref<1x1x8xf32, #tpu.memory_space<vmem>>, vector<1x1x8xf32>
    %30 = vector.shape_cast %29 : vector<1x1x8xf32> to vector<1x8xf32>
    %cst_17 = arith.constant 1.000000e+00 : f32
    %31 = vector.broadcast %cst_17 : f32 to vector<1x8xf32>
    %32 = arith.subf %31, %30 : vector<1x8xf32>
    %cst_18 = arith.constant -1.000000e+09 : f32
    %33 = vector.broadcast %cst_18 : f32 to vector<1x8xf32>
    %34 = arith.mulf %32, %33 : vector<1x8xf32>
    %35 = arith.truncf %25 : vector<8x32xf32> to vector<8x32xbf16>
    %36 = vector.shape_cast %35 : vector<8x32xbf16> to vector<1x8x32xbf16>
    %37 = vector.broadcast %36 : vector<1x8x32xbf16> to vector<4x8x32xbf16>
    %c0_19 = arith.constant 0 : index
    %c0_20 = arith.constant 0 : index
    %c0_21 = arith.constant 0 : index
    %c0_22 = arith.constant 0 : index
    %38 = vector.load %arg5[%c0_19, %c0_20, %c0_21, %c0_22] : memref<2x4x32x8xbf16, #tpu.memory_space<vmem>>, vector<1x4x32x8xbf16>
    %39 = vector.shape_cast %38 : vector<1x4x32x8xbf16> to vector<4x32x8xbf16>
    "tpu.trace_start"() <{level = 10 : i32, message = "hsk,hkd->hsd"}> : () -> ()
    %cst_23 = arith.constant dense<0.000000e+00> : vector<4x8x8xf32>
    %40 = tpu.matmul %37, %39, %cst_23 {dimension_numbers = #tpu.dot_dimension_numbers<[2], [1], [1], [2], [0, 0, 0, 1, 1, 2], [0], [0]>} : vector<4x8x32xbf16>, vector<4x32x8xbf16>, vector<4x8x8xf32> -> vector<4x8x8xf32>
    "tpu.trace_stop"() : () -> ()
    %c0_24 = arith.constant 0 : index
    %c0_25 = arith.constant 0 : index
    %c0_26 = arith.constant 0 : index
    %c0_27 = arith.constant 0 : index
    %41 = vector.load %arg6[%c0_24, %c0_25, %c0_26, %c0_27] : memref<2x4x1x8xf32, #tpu.memory_space<vmem>>, vector<1x4x1x8xf32>
    %42 = vector.shape_cast %41 : vector<1x4x1x8xf32> to vector<4x1x8xf32>
    %43 = vector.broadcast %42 : vector<4x1x8xf32> to vector<4x8x8xf32>
    %44 = arith.addf %40, %43 : vector<4x8x8xf32>
    %c0_28 = arith.constant 0 : index
    %c0_29 = arith.constant 0 : index
    %c0_30 = arith.constant 0 : index
    %c0_31 = arith.constant 0 : index
    %45 = vector.load %arg7[%c0_28, %c0_29, %c0_30, %c0_31] : memref<2x4x32x8xbf16, #tpu.memory_space<vmem>>, vector<1x4x32x8xbf16>
    %46 = vector.shape_cast %45 : vector<1x4x32x8xbf16> to vector<4x32x8xbf16>
    "tpu.trace_start"() <{level = 10 : i32, message = "hsk,hkd->hsd"}> : () -> ()
    %cst_32 = arith.constant dense<0.000000e+00> : vector<4x8x8xf32>
    %47 = tpu.matmul %37, %46, %cst_32 {dimension_numbers = #tpu.dot_dimension_numbers<[2], [1], [1], [2], [0, 0, 0, 1, 1, 2], [0], [0]>} : vector<4x8x32xbf16>, vector<4x32x8xbf16>, vector<4x8x8xf32> -> vector<4x8x8xf32>
    "tpu.trace_stop"() : () -> ()
    %c0_33 = arith.constant 0 : index
    %c0_34 = arith.constant 0 : index
    %c0_35 = arith.constant 0 : index
    %c0_36 = arith.constant 0 : index
    %48 = vector.load %arg8[%c0_33, %c0_34, %c0_35, %c0_36] : memref<2x4x1x8xf32, #tpu.memory_space<vmem>>, vector<1x4x1x8xf32>
    %49 = vector.shape_cast %48 : vector<1x4x1x8xf32> to vector<4x1x8xf32>
    %50 = vector.broadcast %49 : vector<4x1x8xf32> to vector<4x8x8xf32>
    %51 = arith.addf %47, %50 : vector<4x8x8xf32>
    %c0_37 = arith.constant 0 : index
    %c0_38 = arith.constant 0 : index
    %c0_39 = arith.constant 0 : index
    %c0_40 = arith.constant 0 : index
    %52 = vector.load %arg9[%c0_37, %c0_38, %c0_39, %c0_40] : memref<2x4x32x8xbf16, #tpu.memory_space<vmem>>, vector<1x4x32x8xbf16>
    %53 = vector.shape_cast %52 : vector<1x4x32x8xbf16> to vector<4x32x8xbf16>
    "tpu.trace_start"() <{level = 10 : i32, message = "hsk,hkd->hsd"}> : () -> ()
    %cst_41 = arith.constant dense<0.000000e+00> : vector<4x8x8xf32>
    %54 = tpu.matmul %37, %53, %cst_41 {dimension_numbers = #tpu.dot_dimension_numbers<[2], [1], [1], [2], [0, 0, 0, 1, 1, 2], [0], [0]>} : vector<4x8x32xbf16>, vector<4x32x8xbf16>, vector<4x8x8xf32> -> vector<4x8x8xf32>
    "tpu.trace_stop"() : () -> ()
    %c0_42 = arith.constant 0 : index
    %c0_43 = arith.constant 0 : index
    %c0_44 = arith.constant 0 : index
    %c0_45 = arith.constant 0 : index
    %55 = vector.load %arg10[%c0_42, %c0_43, %c0_44, %c0_45] : memref<2x4x1x8xf32, #tpu.memory_space<vmem>>, vector<1x4x1x8xf32>
    %56 = vector.shape_cast %55 : vector<1x4x1x8xf32> to vector<4x1x8xf32>
    %57 = vector.broadcast %56 : vector<4x1x8xf32> to vector<4x8x8xf32>
    %58 = arith.addf %54, %57 : vector<4x8x8xf32>
    %cst_46 = arith.constant 0.353553385 : f32
    %59 = vector.broadcast %cst_46 : f32 to vector<4x8x8xf32>
    %60 = arith.mulf %44, %59 : vector<4x8x8xf32>
    %61 = arith.truncf %60 : vector<4x8x8xf32> to vector<4x8x8xbf16>
    %62 = arith.truncf %51 : vector<4x8x8xf32> to vector<4x8x8xbf16>
    "tpu.trace_start"() <{level = 10 : i32, message = "hqd,hkd->hqk"}> : () -> ()
    %cst_47 = arith.constant dense<0.000000e+00> : vector<4x8x8xf32>
    %63 = tpu.matmul %61, %62, %cst_47 {dimension_numbers = #tpu.dot_dimension_numbers<[2], [2], [1], [1], [0, 0, 0, 1, 1, 1], [0], [0]>} : vector<4x8x8xbf16>, vector<4x8x8xbf16>, vector<4x8x8xf32> -> vector<4x8x8xf32>
    "tpu.trace_stop"() : () -> ()
    %64 = vector.shape_cast %34 : vector<1x8xf32> to vector<1x1x8xf32>
    %65 = vector.broadcast %64 : vector<1x1x8xf32> to vector<4x8x8xf32>
    %66 = arith.addf %63, %65 : vector<4x8x8xf32>
    %cst_48 = arith.constant dense<0xFF800000> : vector<4x8xf32>
    %67 = vector.multi_reduction <maximumf>, %66, %cst_48 [2] : vector<4x8x8xf32> to vector<4x8xf32>
    %68 = vector.shape_cast %67 : vector<4x8xf32> to vector<4x8x1xf32>
    %69 = vector.broadcast %68 : vector<4x8x1xf32> to vector<4x8x8xf32>
    %70 = arith.subf %66, %69 : vector<4x8x8xf32>
    %71 = math.exp %70 : vector<4x8x8xf32>
    %cst_49 = arith.constant dense<0.000000e+00> : vector<4x8xf32>
    %72 = vector.multi_reduction <add>, %71, %cst_49 [2] : vector<4x8x8xf32> to vector<4x8xf32>
    %73 = vector.shape_cast %72 : vector<4x8xf32> to vector<4x8x1xf32>
    %74 = tpu.reciprocal %73 {approx = true} : vector<4x8x1xf32> -> vector<4x8x1xf32>
    %75 = vector.broadcast %74 : vector<4x8x1xf32> to vector<4x8x8xf32>
    %76 = arith.mulf %71, %75 : vector<4x8x8xf32>
    %77 = arith.truncf %76 : vector<4x8x8xf32> to vector<4x8x8xbf16>
    %78 = arith.truncf %58 : vector<4x8x8xf32> to vector<4x8x8xbf16>
    "tpu.trace_start"() <{level = 10 : i32, message = "hqk,hkd->hqd"}> : () -> ()
    %cst_50 = arith.constant dense<0.000000e+00> : vector<4x8x8xf32>
    %79 = tpu.matmul %77, %78, %cst_50 {dimension_numbers = #tpu.dot_dimension_numbers<[2], [1], [1], [2], [0, 0, 0, 1, 1, 2], [0], [0]>} : vector<4x8x8xbf16>, vector<4x8x8xbf16>, vector<4x8x8xf32> -> vector<4x8x8xf32>
    "tpu.trace_stop"() : () -> ()
    %80 = arith.truncf %79 : vector<4x8x8xf32> to vector<4x8x8xbf16>
    %c0_51 = arith.constant 0 : index
    %c0_52 = arith.constant 0 : index
    %c0_53 = arith.constant 0 : index
    %c0_54 = arith.constant 0 : index
    %81 = vector.load %arg11[%c0_51, %c0_52, %c0_53, %c0_54] : memref<2x4x8x32xbf16, #tpu.memory_space<vmem>>, vector<1x4x8x32xbf16>
    %82 = vector.shape_cast %81 : vector<1x4x8x32xbf16> to vector<4x8x32xbf16>
    "tpu.trace_start"() <{level = 10 : i32, message = "hsd,hdo->hso"}> : () -> ()
    %cst_55 = arith.constant dense<0.000000e+00> : vector<4x8x32xf32>
    %83 = tpu.matmul %80, %82, %cst_55 {dimension_numbers = #tpu.dot_dimension_numbers<[2], [1], [1], [2], [0, 0, 0, 1, 1, 2], [0], [0]>} : vector<4x8x8xbf16>, vector<4x8x32xbf16>, vector<4x8x32xf32> -> vector<4x8x32xf32>
    "tpu.trace_stop"() : () -> ()
    %cst_56 = arith.constant dense<0.000000e+00> : vector<8x32xf32>
    %84 = vector.multi_reduction <add>, %83, %cst_56 [0] : vector<4x8x32xf32> to vector<8x32xf32>
    %c0_57 = arith.constant 0 : index
    %c0_58 = arith.constant 0 : index
    %c0_59 = arith.constant 0 : index
    %85 = vector.load %arg12[%c0_57, %c0_58, %c0_59] : memref<2x1x32xf32, #tpu.memory_space<vmem>>, vector<1x1x32xf32>
    %86 = vector.shape_cast %85 : vector<1x1x32xf32> to vector<1x32xf32>
    %87 = vector.broadcast %86 : vector<1x32xf32> to vector<8x32xf32>
    %88 = arith.addf %84, %87 : vector<8x32xf32>
    %89 = arith.addf %25, %88 : vector<8x32xf32>
    %c0_60 = arith.constant 0 : index
    %c0_61 = arith.constant 0 : index
    %c0_62 = arith.constant 0 : index
    %90 = vector.load %arg13[%c0_60, %c0_61, %c0_62] : memref<2x1x32xf32, #tpu.memory_space<vmem>>, vector<1x1x32xf32>
    %91 = vector.shape_cast %90 : vector<1x1x32xf32> to vector<1x32xf32>
    %c0_63 = arith.constant 0 : index
    %c0_64 = arith.constant 0 : index
    %c0_65 = arith.constant 0 : index
    %92 = vector.load %arg14[%c0_63, %c0_64, %c0_65] : memref<2x1x32xf32, #tpu.memory_space<vmem>>, vector<1x1x32xf32>
    %93 = vector.shape_cast %92 : vector<1x1x32xf32> to vector<1x32xf32>
    %cst_66 = arith.constant dense<0.000000e+00> : vector<8xf32>
    %94 = vector.multi_reduction <add>, %89, %cst_66 [1] : vector<8x32xf32> to vector<8xf32>
    %95 = vector.shape_cast %94 : vector<8xf32> to vector<8x1xf32>
    %cst_67 = arith.constant 3.200000e+01 : f32
    %96 = vector.broadcast %cst_67 : f32 to vector<8x1xf32>
    %97 = arith.divf %95, %96 : vector<8x1xf32>
    %98 = vector.broadcast %97 : vector<8x1xf32> to vector<8x32xf32>
    %99 = arith.subf %89, %98 : vector<8x32xf32>
    %100 = arith.mulf %99, %99 : vector<8x32xf32>
    %cst_68 = arith.constant dense<0.000000e+00> : vector<8xf32>
    %101 = vector.multi_reduction <add>, %100, %cst_68 [1] : vector<8x32xf32> to vector<8xf32>
    %102 = vector.shape_cast %101 : vector<8xf32> to vector<8x1xf32>
    %cst_69 = arith.constant 3.200000e+01 : f32
    %103 = vector.broadcast %cst_69 : f32 to vector<8x1xf32>
    %104 = arith.divf %102, %103 : vector<8x1xf32>
    %cst_70 = arith.constant 9.99999996E-13 : f32
    %105 = vector.broadcast %cst_70 : f32 to vector<8x1xf32>
    %106 = arith.addf %104, %105 : vector<8x1xf32>
    %107 = math.rsqrt %106 : vector<8x1xf32>
    %108 = vector.broadcast %97 : vector<8x1xf32> to vector<8x32xf32>
    %109 = arith.subf %89, %108 : vector<8x32xf32>
    %110 = vector.broadcast %107 : vector<8x1xf32> to vector<8x32xf32>
    %111 = arith.mulf %109, %110 : vector<8x32xf32>
    %112 = vector.broadcast %91 : vector<1x32xf32> to vector<8x32xf32>
    %113 = arith.mulf %111, %112 : vector<8x32xf32>
    %114 = vector.broadcast %93 : vector<1x32xf32> to vector<8x32xf32>
    %115 = arith.addf %113, %114 : vector<8x32xf32>
    %116 = arith.truncf %115 : vector<8x32xf32> to vector<8x32xbf16>
    %c0_71 = arith.constant 0 : index
    %c0_72 = arith.constant 0 : index
    %c0_73 = arith.constant 0 : index
    %117 = vector.load %arg15[%c0_71, %c0_72, %c0_73] : memref<2x32x64xbf16, #tpu.memory_space<vmem>>, vector<1x32x64xbf16>
    %118 = vector.shape_cast %117 : vector<1x32x64xbf16> to vector<32x64xbf16>
    %cst_74 = arith.constant dense<0.000000e+00> : vector<8x64xf32>
    %119 = tpu.matmul %116, %118, %cst_74 {dimension_numbers = #tpu.dot_dimension_numbers<[1], [0], [0], [1], [0, 0, 1, 1], [], []>} : vector<8x32xbf16>, vector<32x64xbf16>, vector<8x64xf32> -> vector<8x64xf32>
    %c0_75 = arith.constant 0 : index
    %c0_76 = arith.constant 0 : index
    %c0_77 = arith.constant 0 : index
    %120 = vector.load %arg16[%c0_75, %c0_76, %c0_77] : memref<2x1x64xf32, #tpu.memory_space<vmem>>, vector<1x1x64xf32>
    %121 = vector.shape_cast %120 : vector<1x1x64xf32> to vector<1x64xf32>
    %122 = vector.broadcast %121 : vector<1x64xf32> to vector<8x64xf32>
    %123 = arith.addf %119, %122 : vector<8x64xf32>
    %cst_78 = arith.constant 5.000000e-01 : f32
    %124 = vector.broadcast %cst_78 : f32 to vector<8x64xf32>
    %125 = arith.mulf %124, %123 : vector<8x64xf32>
    %cst_79 = arith.constant 4.471500e-02 : f32
    %126 = vector.broadcast %cst_79 : f32 to vector<8x64xf32>
    %127 = arith.mulf %126, %123 : vector<8x64xf32>
    %128 = arith.mulf %127, %123 : vector<8x64xf32>
    %129 = arith.mulf %128, %123 : vector<8x64xf32>
    %130 = arith.addf %123, %129 : vector<8x64xf32>
    %cst_80 = arith.constant 0.797884583 : f32
    %131 = vector.broadcast %cst_80 : f32 to vector<8x64xf32>
    %132 = arith.mulf %131, %130 : vector<8x64xf32>
    %133 = math.tanh %132 : vector<8x64xf32>
    %cst_81 = arith.constant 1.000000e+00 : f32
    %134 = vector.broadcast %cst_81 : f32 to vector<8x64xf32>
    %135 = arith.addf %134, %133 : vector<8x64xf32>
    %136 = arith.mulf %125, %135 : vector<8x64xf32>
    %137 = arith.truncf %136 : vector<8x64xf32> to vector<8x64xbf16>
    %c0_82 = arith.constant 0 : index
    %c0_83 = arith.constant 0 : index
    %c0_84 = arith.constant 0 : index
    %138 = vector.load %arg17[%c0_82, %c0_83, %c0_84] : memref<2x64x32xbf16, #tpu.memory_space<vmem>>, vector<1x64x32xbf16>
    %139 = vector.shape_cast %138 : vector<1x64x32xbf16> to vector<64x32xbf16>
    %cst_85 = arith.constant dense<0.000000e+00> : vector<8x32xf32>
    %140 = tpu.matmul %137, %139, %cst_85 {dimension_numbers = #tpu.dot_dimension_numbers<[1], [0], [0], [1], [0, 0, 1, 1], [], []>} : vector<8x64xbf16>, vector<64x32xbf16>, vector<8x32xf32> -> vector<8x32xf32>
    %c0_86 = arith.constant 0 : index
    %c0_87 = arith.constant 0 : index
    %c0_88 = arith.constant 0 : index
    %141 = vector.load %arg18[%c0_86, %c0_87, %c0_88] : memref<2x1x32xf32, #tpu.memory_space<vmem>>, vector<1x1x32xf32>
    %142 = vector.shape_cast %141 : vector<1x1x32xf32> to vector<1x32xf32>
    %143 = vector.broadcast %142 : vector<1x32xf32> to vector<8x32xf32>
    %144 = arith.addf %140, %143 : vector<8x32xf32>
    %145 = arith.addf %115, %144 : vector<8x32xf32>
    %c0_89 = arith.constant 0 : index
    %c0_90 = arith.constant 0 : index
    %c0_91 = arith.constant 0 : index
    %146 = vector.load %arg19[%c0_89, %c0_90, %c0_91] : memref<2x1x32xf32, #tpu.memory_space<vmem>>, vector<1x1x32xf32>
    %147 = vector.shape_cast %146 : vector<1x1x32xf32> to vector<1x32xf32>
    %c0_92 = arith.constant 0 : index
    %c0_93 = arith.constant 0 : index
    %c0_94 = arith.constant 0 : index
    %148 = vector.load %arg20[%c0_92, %c0_93, %c0_94] : memref<2x1x32xf32, #tpu.memory_space<vmem>>, vector<1x1x32xf32>
    %149 = vector.shape_cast %148 : vector<1x1x32xf32> to vector<1x32xf32>
    %cst_95 = arith.constant dense<0.000000e+00> : vector<8xf32>
    %150 = vector.multi_reduction <add>, %145, %cst_95 [1] : vector<8x32xf32> to vector<8xf32>
    %151 = vector.shape_cast %150 : vector<8xf32> to vector<8x1xf32>
    %cst_96 = arith.constant 3.200000e+01 : f32
    %152 = vector.broadcast %cst_96 : f32 to vector<8x1xf32>
    %153 = arith.divf %151, %152 : vector<8x1xf32>
    %154 = vector.broadcast %153 : vector<8x1xf32> to vector<8x32xf32>
    %155 = arith.subf %145, %154 : vector<8x32xf32>
    %156 = arith.mulf %155, %155 : vector<8x32xf32>
    %cst_97 = arith.constant dense<0.000000e+00> : vector<8xf32>
    %157 = vector.multi_reduction <add>, %156, %cst_97 [1] : vector<8x32xf32> to vector<8xf32>
    %158 = vector.shape_cast %157 : vector<8xf32> to vector<8x1xf32>
    %cst_98 = arith.constant 3.200000e+01 : f32
    %159 = vector.broadcast %cst_98 : f32 to vector<8x1xf32>
    %160 = arith.divf %158, %159 : vector<8x1xf32>
    %cst_99 = arith.constant 9.99999996E-13 : f32
    %161 = vector.broadcast %cst_99 : f32 to vector<8x1xf32>
    %162 = arith.addf %160, %161 : vector<8x1xf32>
    %163 = math.rsqrt %162 : vector<8x1xf32>
    %164 = vector.broadcast %153 : vector<8x1xf32> to vector<8x32xf32>
    %165 = arith.subf %145, %164 : vector<8x32xf32>
    %166 = vector.broadcast %163 : vector<8x1xf32> to vector<8x32xf32>
    %167 = arith.mulf %165, %166 : vector<8x32xf32>
    %168 = vector.broadcast %147 : vector<1x32xf32> to vector<8x32xf32>
    %169 = arith.mulf %167, %168 : vector<8x32xf32>
    %170 = vector.broadcast %149 : vector<1x32xf32> to vector<8x32xf32>
    %171 = arith.addf %169, %170 : vector<8x32xf32>
    %c0_100 = arith.constant 0 : index
    %c1 = arith.constant 1 : index
    %c0_101 = arith.constant 0 : index
    %c0_102 = arith.constant 0 : index
    %172 = vector.load %arg23[%c0_100, %c1, %c0_101, %c0_102] : memref<1x3x8x32xf32, #tpu.memory_space<vmem>>, vector<1x1x8x32xf32>
    %173 = vector.shape_cast %172 : vector<1x1x8x32xf32> to vector<8x32xf32>
    %174 = vector.shape_cast %171 : vector<8x32xf32> to vector<1x1x8x32xf32>
    tpu.vector_store %arg23[%c0_100, %c1, %c0_101, %c0_102], %174 {strides = array<i32>} : memref<1x3x8x32xf32, #tpu.memory_space<vmem>>, vector<1x1x8x32xf32>,
    %175 = arith.truncf %171 : vector<8x32xf32> to vector<8x32xbf16>
    %176 = vector.shape_cast %175 : vector<8x32xbf16> to vector<1x8x32xbf16>
    %177 = vector.broadcast %176 : vector<1x8x32xbf16> to vector<4x8x32xbf16>
    %c1_103 = arith.constant 1 : index
    %c0_104 = arith.constant 0 : index
    %c0_105 = arith.constant 0 : index
    %c0_106 = arith.constant 0 : index
    %178 = vector.load %arg5[%c1_103, %c0_104, %c0_105, %c0_106] : memref<2x4x32x8xbf16, #tpu.memory_space<vmem>>, vector<1x4x32x8xbf16>
    %179 = vector.shape_cast %178 : vector<1x4x32x8xbf16> to vector<4x32x8xbf16>
    "tpu.trace_start"() <{level = 10 : i32, message = "hsk,hkd->hsd"}> : () -> ()
    %cst_107 = arith.constant dense<0.000000e+00> : vector<4x8x8xf32>
    %180 = tpu.matmul %177, %179, %cst_107 {dimension_numbers = #tpu.dot_dimension_numbers<[2], [1], [1], [2], [0, 0, 0, 1, 1, 2], [0], [0]>} : vector<4x8x32xbf16>, vector<4x32x8xbf16>, vector<4x8x8xf32> -> vector<4x8x8xf32>
    "tpu.trace_stop"() : () -> ()
    %c1_108 = arith.constant 1 : index
    %c0_109 = arith.constant 0 : index
    %c0_110 = arith.constant 0 : index
    %c0_111 = arith.constant 0 : index
    %181 = vector.load %arg6[%c1_108, %c0_109, %c0_110, %c0_111] : memref<2x4x1x8xf32, #tpu.memory_space<vmem>>, vector<1x4x1x8xf32>
    %182 = vector.shape_cast %181 : vector<1x4x1x8xf32> to vector<4x1x8xf32>
    %183 = vector.broadcast %182 : vector<4x1x8xf32> to vector<4x8x8xf32>
    %184 = arith.addf %180, %183 : vector<4x8x8xf32>
    %c1_112 = arith.constant 1 : index
    %c0_113 = arith.constant 0 : index
    %c0_114 = arith.constant 0 : index
    %c0_115 = arith.constant 0 : index
    %185 = vector.load %arg7[%c1_112, %c0_113, %c0_114, %c0_115] : memref<2x4x32x8xbf16, #tpu.memory_space<vmem>>, vector<1x4x32x8xbf16>
    %186 = vector.shape_cast %185 : vector<1x4x32x8xbf16> to vector<4x32x8xbf16>
    "tpu.trace_start"() <{level = 10 : i32, message = "hsk,hkd->hsd"}> : () -> ()
    %cst_116 = arith.constant dense<0.000000e+00> : vector<4x8x8xf32>
    %187 = tpu.matmul %177, %186, %cst_116 {dimension_numbers = #tpu.dot_dimension_numbers<[2], [1], [1], [2], [0, 0, 0, 1, 1, 2], [0], [0]>} : vector<4x8x32xbf16>, vector<4x32x8xbf16>, vector<4x8x8xf32> -> vector<4x8x8xf32>
    "tpu.trace_stop"() : () -> ()
    %c1_117 = arith.constant 1 : index
    %c0_118 = arith.constant 0 : index
    %c0_119 = arith.constant 0 : index
    %c0_120 = arith.constant 0 : index
    %188 = vector.load %arg8[%c1_117, %c0_118, %c0_119, %c0_120] : memref<2x4x1x8xf32, #tpu.memory_space<vmem>>, vector<1x4x1x8xf32>
    %189 = vector.shape_cast %188 : vector<1x4x1x8xf32> to vector<4x1x8xf32>
    %190 = vector.broadcast %189 : vector<4x1x8xf32> to vector<4x8x8xf32>
    %191 = arith.addf %187, %190 : vector<4x8x8xf32>
    %c1_121 = arith.constant 1 : index
    %c0_122 = arith.constant 0 : index
    %c0_123 = arith.constant 0 : index
    %c0_124 = arith.constant 0 : index
    %192 = vector.load %arg9[%c1_121, %c0_122, %c0_123, %c0_124] : memref<2x4x32x8xbf16, #tpu.memory_space<vmem>>, vector<1x4x32x8xbf16>
    %193 = vector.shape_cast %192 : vector<1x4x32x8xbf16> to vector<4x32x8xbf16>
    "tpu.trace_start"() <{level = 10 : i32, message = "hsk,hkd->hsd"}> : () -> ()
    %cst_125 = arith.constant dense<0.000000e+00> : vector<4x8x8xf32>
    %194 = tpu.matmul %177, %193, %cst_125 {dimension_numbers = #tpu.dot_dimension_numbers<[2], [1], [1], [2], [0, 0, 0, 1, 1, 2], [0], [0]>} : vector<4x8x32xbf16>, vector<4x32x8xbf16>, vector<4x8x8xf32> -> vector<4x8x8xf32>
    "tpu.trace_stop"() : () -> ()
    %c1_126 = arith.constant 1 : index
    %c0_127 = arith.constant 0 : index
    %c0_128 = arith.constant 0 : index
    %c0_129 = arith.constant 0 : index
    %195 = vector.load %arg10[%c1_126, %c0_127, %c0_128, %c0_129] : memref<2x4x1x8xf32, #tpu.memory_space<vmem>>, vector<1x4x1x8xf32>
    %196 = vector.shape_cast %195 : vector<1x4x1x8xf32> to vector<4x1x8xf32>
    %197 = vector.broadcast %196 : vector<4x1x8xf32> to vector<4x8x8xf32>
    %198 = arith.addf %194, %197 : vector<4x8x8xf32>
    %cst_130 = arith.constant 0.353553385 : f32
    %199 = vector.broadcast %cst_130 : f32 to vector<4x8x8xf32>
    %200 = arith.mulf %184, %199 : vector<4x8x8xf32>
    %201 = arith.truncf %200 : vector<4x8x8xf32> to vector<4x8x8xbf16>
    %202 = arith.truncf %191 : vector<4x8x8xf32> to vector<4x8x8xbf16>
    "tpu.trace_start"() <{level = 10 : i32, message = "hqd,hkd->hqk"}> : () -> ()
    %cst_131 = arith.constant dense<0.000000e+00> : vector<4x8x8xf32>
    %203 = tpu.matmul %201, %202, %cst_131 {dimension_numbers = #tpu.dot_dimension_numbers<[2], [2], [1], [1], [0, 0, 0, 1, 1, 1], [0], [0]>} : vector<4x8x8xbf16>, vector<4x8x8xbf16>, vector<4x8x8xf32> -> vector<4x8x8xf32>
    "tpu.trace_stop"() : () -> ()
    %204 = vector.shape_cast %34 : vector<1x8xf32> to vector<1x1x8xf32>
    %205 = vector.broadcast %204 : vector<1x1x8xf32> to vector<4x8x8xf32>
    %206 = arith.addf %203, %205 : vector<4x8x8xf32>
    %cst_132 = arith.constant dense<0xFF800000> : vector<4x8xf32>
    %207 = vector.multi_reduction <maximumf>, %206, %cst_132 [2] : vector<4x8x8xf32> to vector<4x8xf32>
    %208 = vector.shape_cast %207 : vector<4x8xf32> to vector<4x8x1xf32>
    %209 = vector.broadcast %208 : vector<4x8x1xf32> to vector<4x8x8xf32>
    %210 = arith.subf %206, %209 : vector<4x8x8xf32>
    %211 = math.exp %210 : vector<4x8x8xf32>
    %cst_133 = arith.constant dense<0.000000e+00> : vector<4x8xf32>
    %212 = vector.multi_reduction <add>, %211, %cst_133 [2] : vector<4x8x8xf32> to vector<4x8xf32>
    %213 = vector.shape_cast %212 : vector<4x8xf32> to vector<4x8x1xf32>
    %214 = tpu.reciprocal %213 {approx = true} : vector<4x8x1xf32> -> vector<4x8x1xf32>
    %215 = vector.broadcast %214 : vector<4x8x1xf32> to vector<4x8x8xf32>
    %216 = arith.mulf %211, %215 : vector<4x8x8xf32>
    %217 = arith.truncf %216 : vector<4x8x8xf32> to vector<4x8x8xbf16>
    %218 = arith.truncf %198 : vector<4x8x8xf32> to vector<4x8x8xbf16>
    "tpu.trace_start"() <{level = 10 : i32, message = "hqk,hkd->hqd"}> : () -> ()
    %cst_134 = arith.constant dense<0.000000e+00> : vector<4x8x8xf32>
    %219 = tpu.matmul %217, %218, %cst_134 {dimension_numbers = #tpu.dot_dimension_numbers<[2], [1], [1], [2], [0, 0, 0, 1, 1, 2], [0], [0]>} : vector<4x8x8xbf16>, vector<4x8x8xbf16>, vector<4x8x8xf32> -> vector<4x8x8xf32>
    "tpu.trace_stop"() : () -> ()
    %220 = arith.truncf %219 : vector<4x8x8xf32> to vector<4x8x8xbf16>
    %c1_135 = arith.constant 1 : index
    %c0_136 = arith.constant 0 : index
    %c0_137 = arith.constant 0 : index
    %c0_138 = arith.constant 0 : index
    %221 = vector.load %arg11[%c1_135, %c0_136, %c0_137, %c0_138] : memref<2x4x8x32xbf16, #tpu.memory_space<vmem>>, vector<1x4x8x32xbf16>
    %222 = vector.shape_cast %221 : vector<1x4x8x32xbf16> to vector<4x8x32xbf16>
    "tpu.trace_start"() <{level = 10 : i32, message = "hsd,hdo->hso"}> : () -> ()
    %cst_139 = arith.constant dense<0.000000e+00> : vector<4x8x32xf32>
    %223 = tpu.matmul %220, %222, %cst_139 {dimension_numbers = #tpu.dot_dimension_numbers<[2], [1], [1], [2], [0, 0, 0, 1, 1, 2], [0], [0]>} : vector<4x8x8xbf16>, vector<4x8x32xbf16>, vector<4x8x32xf32> -> vector<4x8x32xf32>
    "tpu.trace_stop"() : () -> ()
    %cst_140 = arith.constant dense<0.000000e+00> : vector<8x32xf32>
    %224 = vector.multi_reduction <add>, %223, %cst_140 [0] : vector<4x8x32xf32> to vector<8x32xf32>
    %c1_141 = arith.constant 1 : index
    %c0_142 = arith.constant 0 : index
    %c0_143 = arith.constant 0 : index
    %225 = vector.load %arg12[%c1_141, %c0_142, %c0_143] : memref<2x1x32xf32, #tpu.memory_space<vmem>>, vector<1x1x32xf32>
    %226 = vector.shape_cast %225 : vector<1x1x32xf32> to vector<1x32xf32>
    %227 = vector.broadcast %226 : vector<1x32xf32> to vector<8x32xf32>
    %228 = arith.addf %224, %227 : vector<8x32xf32>
    %229 = arith.addf %171, %228 : vector<8x32xf32>
    %c1_144 = arith.constant 1 : index
    %c0_145 = arith.constant 0 : index
    %c0_146 = arith.constant 0 : index
    %230 = vector.load %arg13[%c1_144, %c0_145, %c0_146] : memref<2x1x32xf32, #tpu.memory_space<vmem>>, vector<1x1x32xf32>
    %231 = vector.shape_cast %230 : vector<1x1x32xf32> to vector<1x32xf32>
    %c1_147 = arith.constant 1 : index
    %c0_148 = arith.constant 0 : index
    %c0_149 = arith.constant 0 : index
    %232 = vector.load %arg14[%c1_147, %c0_148, %c0_149] : memref<2x1x32xf32, #tpu.memory_space<vmem>>, vector<1x1x32xf32>
    %233 = vector.shape_cast %232 : vector<1x1x32xf32> to vector<1x32xf32>
    %cst_150 = arith.constant dense<0.000000e+00> : vector<8xf32>
    %234 = vector.multi_reduction <add>, %229, %cst_150 [1] : vector<8x32xf32> to vector<8xf32>
    %235 = vector.shape_cast %234 : vector<8xf32> to vector<8x1xf32>
    %cst_151 = arith.constant 3.200000e+01 : f32
    %236 = vector.broadcast %cst_151 : f32 to vector<8x1xf32>
    %237 = arith.divf %235, %236 : vector<8x1xf32>
    %238 = vector.broadcast %237 : vector<8x1xf32> to vector<8x32xf32>
    %239 = arith.subf %229, %238 : vector<8x32xf32>
    %240 = arith.mulf %239, %239 : vector<8x32xf32>
    %cst_152 = arith.constant dense<0.000000e+00> : vector<8xf32>
    %241 = vector.multi_reduction <add>, %240, %cst_152 [1] : vector<8x32xf32> to vector<8xf32>
    %242 = vector.shape_cast %241 : vector<8xf32> to vector<8x1xf32>
    %cst_153 = arith.constant 3.200000e+01 : f32
    %243 = vector.broadcast %cst_153 : f32 to vector<8x1xf32>
    %244 = arith.divf %242, %243 : vector<8x1xf32>
    %cst_154 = arith.constant 9.99999996E-13 : f32
    %245 = vector.broadcast %cst_154 : f32 to vector<8x1xf32>
    %246 = arith.addf %244, %245 : vector<8x1xf32>
    %247 = math.rsqrt %246 : vector<8x1xf32>
    %248 = vector.broadcast %237 : vector<8x1xf32> to vector<8x32xf32>
    %249 = arith.subf %229, %248 : vector<8x32xf32>
    %250 = vector.broadcast %247 : vector<8x1xf32> to vector<8x32xf32>
    %251 = arith.mulf %249, %250 : vector<8x32xf32>
    %252 = vector.broadcast %231 : vector<1x32xf32> to vector<8x32xf32>
    %253 = arith.mulf %251, %252 : vector<8x32xf32>
    %254 = vector.broadcast %233 : vector<1x32xf32> to vector<8x32xf32>
    %255 = arith.addf %253, %254 : vector<8x32xf32>
    %256 = arith.truncf %255 : vector<8x32xf32> to vector<8x32xbf16>
    %c1_155 = arith.constant 1 : index
    %c0_156 = arith.constant 0 : index
    %c0_157 = arith.constant 0 : index
    %257 = vector.load %arg15[%c1_155, %c0_156, %c0_157] : memref<2x32x64xbf16, #tpu.memory_space<vmem>>, vector<1x32x64xbf16>
    %258 = vector.shape_cast %257 : vector<1x32x64xbf16> to vector<32x64xbf16>
    %cst_158 = arith.constant dense<0.000000e+00> : vector<8x64xf32>
    %259 = tpu.matmul %256, %258, %cst_158 {dimension_numbers = #tpu.dot_dimension_numbers<[1], [0], [0], [1], [0, 0, 1, 1], [], []>} : vector<8x32xbf16>, vector<32x64xbf16>, vector<8x64xf32> -> vector<8x64xf32>
    %c1_159 = arith.constant 1 : index
    %c0_160 = arith.constant 0 : index
    %c0_161 = arith.constant 0 : index
    %260 = vector.load %arg16[%c1_159, %c0_160, %c0_161] : memref<2x1x64xf32, #tpu.memory_space<vmem>>, vector<1x1x64xf32>
    %261 = vector.shape_cast %260 : vector<1x1x64xf32> to vector<1x64xf32>
    %262 = vector.broadcast %261 : vector<1x64xf32> to vector<8x64xf32>
    %263 = arith.addf %259, %262 : vector<8x64xf32>
    %cst_162 = arith.constant 5.000000e-01 : f32
    %264 = vector.broadcast %cst_162 : f32 to vector<8x64xf32>
    %265 = arith.mulf %264, %263 : vector<8x64xf32>
    %cst_163 = arith.constant 4.471500e-02 : f32
    %266 = vector.broadcast %cst_163 : f32 to vector<8x64xf32>
    %267 = arith.mulf %266, %263 : vector<8x64xf32>
    %268 = arith.mulf %267, %263 : vector<8x64xf32>
    %269 = arith.mulf %268, %263 : vector<8x64xf32>
    %270 = arith.addf %263, %269 : vector<8x64xf32>
    %cst_164 = arith.constant 0.797884583 : f32
    %271 = vector.broadcast %cst_164 : f32 to vector<8x64xf32>
    %272 = arith.mulf %271, %270 : vector<8x64xf32>
    %273 = math.tanh %272 : vector<8x64xf32>
    %cst_165 = arith.constant 1.000000e+00 : f32
    %274 = vector.broadcast %cst_165 : f32 to vector<8x64xf32>
    %275 = arith.addf %274, %273 : vector<8x64xf32>
    %276 = arith.mulf %265, %275 : vector<8x64xf32>
    %277 = arith.truncf %276 : vector<8x64xf32> to vector<8x64xbf16>
    %c1_166 = arith.constant 1 : index
    %c0_167 = arith.constant 0 : index
    %c0_168 = arith.constant 0 : index
    %278 = vector.load %arg17[%c1_166, %c0_167, %c0_168] : memref<2x64x32xbf16, #tpu.memory_space<vmem>>, vector<1x64x32xbf16>
    %279 = vector.shape_cast %278 : vector<1x64x32xbf16> to vector<64x32xbf16>
    %cst_169 = arith.constant dense<0.000000e+00> : vector<8x32xf32>
    %280 = tpu.matmul %277, %279, %cst_169 {dimension_numbers = #tpu.dot_dimension_numbers<[1], [0], [0], [1], [0, 0, 1, 1], [], []>} : vector<8x64xbf16>, vector<64x32xbf16>, vector<8x32xf32> -> vector<8x32xf32>
    %c1_170 = arith.constant 1 : index
    %c0_171 = arith.constant 0 : index
    %c0_172 = arith.constant 0 : index
    %281 = vector.load %arg18[%c1_170, %c0_171, %c0_172] : memref<2x1x32xf32, #tpu.memory_space<vmem>>, vector<1x1x32xf32>
    %282 = vector.shape_cast %281 : vector<1x1x32xf32> to vector<1x32xf32>
    %283 = vector.broadcast %282 : vector<1x32xf32> to vector<8x32xf32>
    %284 = arith.addf %280, %283 : vector<8x32xf32>
    %285 = arith.addf %255, %284 : vector<8x32xf32>
    %c1_173 = arith.constant 1 : index
    %c0_174 = arith.constant 0 : index
    %c0_175 = arith.constant 0 : index
    %286 = vector.load %arg19[%c1_173, %c0_174, %c0_175] : memref<2x1x32xf32, #tpu.memory_space<vmem>>, vector<1x1x32xf32>
    %287 = vector.shape_cast %286 : vector<1x1x32xf32> to vector<1x32xf32>
    %c1_176 = arith.constant 1 : index
    %c0_177 = arith.constant 0 : index
    %c0_178 = arith.constant 0 : index
    %288 = vector.load %arg20[%c1_176, %c0_177, %c0_178] : memref<2x1x32xf32, #tpu.memory_space<vmem>>, vector<1x1x32xf32>
    %289 = vector.shape_cast %288 : vector<1x1x32xf32> to vector<1x32xf32>
    %cst_179 = arith.constant dense<0.000000e+00> : vector<8xf32>
    %290 = vector.multi_reduction <add>, %285, %cst_179 [1] : vector<8x32xf32> to vector<8xf32>
    %291 = vector.shape_cast %290 : vector<8xf32> to vector<8x1xf32>
    %cst_180 = arith.constant 3.200000e+01 : f32
    %292 = vector.broadcast %cst_180 : f32 to vector<8x1xf32>
    %293 = arith.divf %291, %292 : vector<8x1xf32>
    %294 = vector.broadcast %293 : vector<8x1xf32> to vector<8x32xf32>
    %295 = arith.subf %285, %294 : vector<8x32xf32>
    %296 = arith.mulf %295, %295 : vector<8x32xf32>
    %cst_181 = arith.constant dense<0.000000e+00> : vector<8xf32>
    %297 = vector.multi_reduction <add>, %296, %cst_181 [1] : vector<8x32xf32> to vector<8xf32>
    %298 = vector.shape_cast %297 : vector<8xf32> to vector<8x1xf32>
    %cst_182 = arith.constant 3.200000e+01 : f32
    %299 = vector.broadcast %cst_182 : f32 to vector<8x1xf32>
    %300 = arith.divf %298, %299 : vector<8x1xf32>
    %cst_183 = arith.constant 9.99999996E-13 : f32
    %301 = vector.broadcast %cst_183 : f32 to vector<8x1xf32>
    %302 = arith.addf %300, %301 : vector<8x1xf32>
    %303 = math.rsqrt %302 : vector<8x1xf32>
    %304 = vector.broadcast %293 : vector<8x1xf32> to vector<8x32xf32>
    %305 = arith.subf %285, %304 : vector<8x32xf32>
    %306 = vector.broadcast %303 : vector<8x1xf32> to vector<8x32xf32>
    %307 = arith.mulf %305, %306 : vector<8x32xf32>
    %308 = vector.broadcast %287 : vector<1x32xf32> to vector<8x32xf32>
    %309 = arith.mulf %307, %308 : vector<8x32xf32>
    %310 = vector.broadcast %289 : vector<1x32xf32> to vector<8x32xf32>
    %311 = arith.addf %309, %310 : vector<8x32xf32>
    %c0_184 = arith.constant 0 : index
    %c2 = arith.constant 2 : index
    %c0_185 = arith.constant 0 : index
    %c0_186 = arith.constant 0 : index
    %312 = vector.load %arg23[%c0_184, %c2, %c0_185, %c0_186] : memref<1x3x8x32xf32, #tpu.memory_space<vmem>>, vector<1x1x8x32xf32>
    %313 = vector.shape_cast %312 : vector<1x1x8x32xf32> to vector<8x32xf32>
    %314 = vector.shape_cast %311 : vector<8x32xf32> to vector<1x1x8x32xf32>
    tpu.vector_store %arg23[%c0_184, %c2, %c0_185, %c0_186], %314 {strides = array<i32>} : memref<1x3x8x32xf32, #tpu.memory_space<vmem>>, vector<1x1x8x32xf32>,
    %315 = vector.extract_strided_slice %311 {offsets = [0, 0], sizes = [1, 32], strides = [1, 1]} : vector<8x32xf32> to vector<1x32xf32>
    %316 = arith.truncf %315 : vector<1x32xf32> to vector<1x32xbf16>
    %c0_187 = arith.constant 0 : index
    %c0_188 = arith.constant 0 : index
    %317 = vector.load %arg21[%c0_187, %c0_188] : memref<32x3xbf16, #tpu.memory_space<vmem>>, vector<32x3xbf16>
    %cst_189 = arith.constant dense<0.000000e+00> : vector<1x3xf32>
    %318 = tpu.matmul %316, %317, %cst_189 {dimension_numbers = #tpu.dot_dimension_numbers<[1], [0], [0], [1], [0, 0, 1, 1], [], []>} : vector<1x32xbf16>, vector<32x3xbf16>, vector<1x3xf32> -> vector<1x3xf32>
    %c0_190 = arith.constant 0 : index
    %c0_191 = arith.constant 0 : index
    %319 = vector.load %arg22[%c0_190, %c0_191] : memref<1x3xf32, #tpu.memory_space<vmem>>, vector<1x3xf32>
    %320 = arith.addf %318, %319 : vector<1x3xf32>
    %c0_192 = arith.constant 0 : index
    %c0_193 = arith.constant 0 : index
    %c0_194 = arith.constant 0 : index
    %321 = vector.load %arg24[%c0_192, %c0_193, %c0_194] : memref<1x1x3xf32, #tpu.memory_space<vmem>>, vector<1x1x3xf32>
    %322 = vector.shape_cast %321 : vector<1x1x3xf32> to vector<1x3xf32>
    %323 = vector.shape_cast %320 : vector<1x3xf32> to vector<1x1x3xf32>
    tpu.vector_store %arg24[%c0_192, %c0_193, %c0_194], %323 {strides = array<i32>} : memref<1x1x3xf32, #tpu.memory_space<vmem>>, vector<1x1x3xf32>,
    return
  }
  func.func @transform_0(%arg0: i32) -> (i32, i32, i32) {
    %c0_i32 = arith.constant 0 : i32
    %c0_i32_0 = arith.constant 0 : i32
    %c0_i32_1 = arith.constant 0 : i32
    return %arg0, %c0_i32, %c0_i32_0 : i32, i32, i32
  }
  func.func @transform_1(%arg0: i32) -> (i32, i32, i32) {
    %c0_i32 = arith.constant 0 : i32
    %c0_i32_0 = arith.constant 0 : i32
    %c0_i32_1 = arith.constant 0 : i32
    return %arg0, %c0_i32, %c0_i32_0 : i32, i32, i32
  }
  func.func @transform_2(%arg0: i32) -> (i32, i32) {
    %c0_i32 = arith.constant 0 : i32
    %c0_i32_0 = arith.constant 0 : i32
    %c0_i32_1 = arith.constant 0 : i32
    return %c0_i32, %c0_i32_0 : i32, i32
  }
  func.func @transform_3(%arg0: i32) -> (i32, i32) {
    %c0_i32 = arith.constant 0 : i32
    %c0_i32_0 = arith.constant 0 : i32
    %c0_i32_1 = arith.constant 0 : i32
    return %c0_i32, %c0_i32_0 : i32, i32
  }
  func.func @transform_4(%arg0: i32) -> (i32, i32, i32, i32) {
    %c0_i32 = arith.constant 0 : i32
    %c0_i32_0 = arith.constant 0 : i32
    %c0_i32_1 = arith.constant 0 : i32
    %c0_i32_2 = arith.constant 0 : i32
    %c0_i32_3 = arith.constant 0 : i32
    return %c0_i32, %c0_i32_0, %c0_i32_1, %c0_i32_2 : i32, i32, i32, i32
  }
  func.func @transform_5(%arg0: i32) -> (i32, i32, i32, i32) {
    %c0_i32 = arith.constant 0 : i32
    %c0_i32_0 = arith.constant 0 : i32
    %c0_i32_1 = arith.constant 0 : i32
    %c0_i32_2 = arith.constant 0 : i32
    %c0_i32_3 = arith.constant 0 : i32
    return %c0_i32, %c0_i32_0, %c0_i32_1, %c0_i32_2 : i32, i32, i32, i32
  }
  func.func @transform_6(%arg0: i32) -> (i32, i32, i32, i32) {
    %c0_i32 = arith.constant 0 : i32
    %c0_i32_0 = arith.constant 0 : i32
    %c0_i32_1 = arith.constant 0 : i32
    %c0_i32_2 = arith.constant 0 : i32
    %c0_i32_3 = arith.constant 0 : i32
    return %c0_i32, %c0_i32_0, %c0_i32_1, %c0_i32_2 : i32, i32, i32, i32
  }
  func.func @transform_7(%arg0: i32) -> (i32, i32, i32, i32) {
    %c0_i32 = arith.constant 0 : i32
    %c0_i32_0 = arith.constant 0 : i32
    %c0_i32_1 = arith.constant 0 : i32
    %c0_i32_2 = arith.constant 0 : i32
    %c0_i32_3 = arith.constant 0 : i32
    return %c0_i32, %c0_i32_0, %c0_i32_1, %c0_i32_2 : i32, i32, i32, i32
  }
  func.func @transform_8(%arg0: i32) -> (i32, i32, i32, i32) {
    %c0_i32 = arith.constant 0 : i32
    %c0_i32_0 = arith.constant 0 : i32
    %c0_i32_1 = arith.constant 0 : i32
    %c0_i32_2 = arith.constant 0 : i32
    %c0_i32_3 = arith.constant 0 : i32
    return %c0_i32, %c0_i32_0, %c0_i32_1, %c0_i32_2 : i32, i32, i32, i32
  }
  func.func @transform_9(%arg0: i32) -> (i32, i32, i32, i32) {
    %c0_i32 = arith.constant 0 : i32
    %c0_i32_0 = arith.constant 0 : i32
    %c0_i32_1 = arith.constant 0 : i32
    %c0_i32_2 = arith.constant 0 : i32
    %c0_i32_3 = arith.constant 0 : i32
    return %c0_i32, %c0_i32_0, %c0_i32_1, %c0_i32_2 : i32, i32, i32, i32
  }
  func.func @transform_10(%arg0: i32) -> (i32, i32, i32, i32) {
    %c0_i32 = arith.constant 0 : i32
    %c0_i32_0 = arith.constant 0 : i32
    %c0_i32_1 = arith.constant 0 : i32
    %c0_i32_2 = arith.constant 0 : i32
    %c0_i32_3 = arith.constant 0 : i32
    return %c0_i32, %c0_i32_0, %c0_i32_1, %c0_i32_2 : i32, i32, i32, i32
  }
  func.func @transform_11(%arg0: i32) -> (i32, i32, i32) {
    %c0_i32 = arith.constant 0 : i32
    %c0_i32_0 = arith.constant 0 : i32
    %c0_i32_1 = arith.constant 0 : i32
    %c0_i32_2 = arith.constant 0 : i32
    return %c0_i32, %c0_i32_0, %c0_i32_1 : i32, i32, i32
  }
  func.func @transform_12(%arg0: i32) -> (i32, i32, i32) {
    %c0_i32 = arith.constant 0 : i32
    %c0_i32_0 = arith.constant 0 : i32
    %c0_i32_1 = arith.constant 0 : i32
    %c0_i32_2 = arith.constant 0 : i32
    return %c0_i32, %c0_i32_0, %c0_i32_1 : i32, i32, i32
  }
  func.func @transform_13(%arg0: i32) -> (i32, i32, i32) {
    %c0_i32 = arith.constant 0 : i32
    %c0_i32_0 = arith.constant 0 : i32
    %c0_i32_1 = arith.constant 0 : i32
    %c0_i32_2 = arith.constant 0 : i32
    return %c0_i32, %c0_i32_0, %c0_i32_1 : i32, i32, i32
  }
  func.func @transform_14(%arg0: i32) -> (i32, i32, i32) {
    %c0_i32 = arith.constant 0 : i32
    %c0_i32_0 = arith.constant 0 : i32
    %c0_i32_1 = arith.constant 0 : i32
    %c0_i32_2 = arith.constant 0 : i32
    return %c0_i32, %c0_i32_0, %c0_i32_1 : i32, i32, i32
  }
  func.func @transform_15(%arg0: i32) -> (i32, i32, i32) {
    %c0_i32 = arith.constant 0 : i32
    %c0_i32_0 = arith.constant 0 : i32
    %c0_i32_1 = arith.constant 0 : i32
    %c0_i32_2 = arith.constant 0 : i32
    return %c0_i32, %c0_i32_0, %c0_i32_1 : i32, i32, i32
  }
  func.func @transform_16(%arg0: i32) -> (i32, i32, i32) {
    %c0_i32 = arith.constant 0 : i32
    %c0_i32_0 = arith.constant 0 : i32
    %c0_i32_1 = arith.constant 0 : i32
    %c0_i32_2 = arith.constant 0 : i32
    return %c0_i32, %c0_i32_0, %c0_i32_1 : i32, i32, i32
  }
  func.func @transform_17(%arg0: i32) -> (i32, i32, i32) {
    %c0_i32 = arith.constant 0 : i32
    %c0_i32_0 = arith.constant 0 : i32
    %c0_i32_1 = arith.constant 0 : i32
    %c0_i32_2 = arith.constant 0 : i32
    return %c0_i32, %c0_i32_0, %c0_i32_1 : i32, i32, i32
  }
  func.func @transform_18(%arg0: i32) -> (i32, i32, i32) {
    %c0_i32 = arith.constant 0 : i32
    %c0_i32_0 = arith.constant 0 : i32
    %c0_i32_1 = arith.constant 0 : i32
    %c0_i32_2 = arith.constant 0 : i32
    return %c0_i32, %c0_i32_0, %c0_i32_1 : i32, i32, i32
  }
  func.func @transform_19(%arg0: i32) -> (i32, i32, i32) {
    %c0_i32 = arith.constant 0 : i32
    %c0_i32_0 = arith.constant 0 : i32
    %c0_i32_1 = arith.constant 0 : i32
    %c0_i32_2 = arith.constant 0 : i32
    return %c0_i32, %c0_i32_0, %c0_i32_1 : i32, i32, i32
  }
  func.func @transform_20(%arg0: i32) -> (i32, i32) {
    %c0_i32 = arith.constant 0 : i32
    %c0_i32_0 = arith.constant 0 : i32
    %c0_i32_1 = arith.constant 0 : i32
    return %c0_i32, %c0_i32_0 : i32, i32
  }
  func.func @transform_21(%arg0: i32) -> (i32, i32) {
    %c0_i32 = arith.constant 0 : i32
    %c0_i32_0 = arith.constant 0 : i32
    %c0_i32_1 = arith.constant 0 : i32
    return %c0_i32, %c0_i32_0 : i32, i32
  }
  func.func @transform_22(%arg0: i32) -> (i32, i32, i32, i32) {
    %c0_i32 = arith.constant 0 : i32
    %c0_i32_0 = arith.constant 0 : i32
    %c0_i32_1 = arith.constant 0 : i32
    %c0_i32_2 = arith.constant 0 : i32
    return %arg0, %c0_i32, %c0_i32_0, %c0_i32_1 : i32, i32, i32, i32
  }
  func.func @transform_23(%arg0: i32) -> (i32, i32, i32) {
    %c0_i32 = arith.constant 0 : i32
    %c0_i32_0 = arith.constant 0 : i32
    %c0_i32_1 = arith.constant 0 : i32
    return %arg0, %c0_i32, %c0_i32_0 : i32, i32, i32
  }
}

</mosaic_0001>

<bundles_post_ra>
// kernel: bert_model_forward.1
= control target key start
LH: loop header
LB: loop body
LE: loop exit
PB: predicated region body
PF: predicated region fallthrough
CT: control target
= control target key end

     0   :  { %s4056_s0 = inlined_call_operand.vmem [shape: f32[2,8,32], index: 0, kind: input, shape index: {}]   ;;  %s4057_s1 = inlined_call_operand.vmem [shape: f32[2,1,8], index: 1, kind: input, shape index: {}]   ;;  %s4058_s2 = inlined_call_operand.vmem [shape: f32[1,32], index: 2, kind: input, shape index: {}]   ;;  %s4059_s3 = inlined_call_operand.vmem [shape: f32[1,32], index: 3, kind: input, shape index: {}]   ;;  %s4060_s4 = inlined_call_operand.vmem [shape: bf16[2,4,32,8], index: 4, kind: input, shape index: {}]   ;;  %s4061_s5 = inlined_call_operand.vmem [shape: f32[2,4,1,8], index: 5, kind: input, shape index: {}]   ;;  %s4062_s6 = inlined_call_operand.vmem [shape: bf16[2,4,32,8], index: 6, kind: input, shape index: {}]   ;;  %s4063_s7 = inlined_call_operand.vmem [shape: f32[2,4,1,8], index: 7, kind: input, shape index: {}]   ;;  %s4064_s8 = inlined_call_operand.vmem [shape: bf16[2,4,32,8], index: 8, kind: input, shape index: {}]   ;;  %s4065_s9 = inlined_call_operand.vmem [shape: f32[2,4,1,8], index: 9, kind: input, shape index: {}]   ;;  %s4066_s10 = inlined_call_operand.vmem [shape: bf16[2,4,8,32], index: 10, kind: input, shape index: {}]   ;;  %s4067_s11 = inlined_call_operand.vmem [shape: f32[2,1,32], index: 11, kind: input, shape index: {}]   ;;  %s4068_s12 = inlined_call_operand.vmem [shape: f32[2,1,32], index: 12, kind: input, shape index: {}]   ;;  %s4069_s13 = inlined_call_operand.vmem [shape: f32[2,1,32], index: 13, kind: input, shape index: {}]   ;;  %s4070_s14 = inlined_call_operand.vmem [shape: bf16[2,32,64], index: 14, kind: input, shape index: {}]   ;;  %s4071_s15 = inlined_call_operand.vmem [shape: f32[2,1,64], index: 15, kind: input, shape index: {}]   ;;  %s4072_s16 = inlined_call_operand.vmem [shape: bf16[2,64,32], index: 16, kind: input, shape index: {}]   ;;  %s4073_s17 = inlined_call_operand.vmem [shape: f32[2,1,32], index: 17, kind: input, shape index: {}]   ;;  %s4074_s18 = inlined_call_operand.vmem [shape: f32[2,1,32], index: 18, kind: input, shape index: {}]   ;;  %s4075_s19 = inlined_call_operand.vmem [shape: f32[2,1,32], index: 19, kind: input, shape index: {}]   ;;  %s4076_s20 = inlined_call_operand.vmem [shape: bf16[32,3], index: 20, kind: input, shape index: {}]   ;;  %s4077_s21 = inlined_call_operand.vmem [shape: f32[1,3], index: 21, kind: input, shape index: {}]   ;;  %s4078_s22 = inlined_call_operand.vmem [shape: f32[2,3,8,32], index: 22, kind: output, shape index: {0}]   ;;  %s4079_s23 = inlined_call_operand.hbm [shape: f32[2,1,3], index: 23, kind: output, shape index: {1}]  }
   0x1   :  { %4095 = sst [smem:[#allocation12_spill]] %s4056_s0 }
   0x2   :  { %4096 = sst [smem:[#allocation13_spill]] %s4057_s1 }
   0x3   :  { %4097 = sst [smem:[#allocation14_spill]] %s4058_s2 }
   0x4   :  { %4098 = sst [smem:[#allocation15_spill]] %s4059_s3 }
   0x5   :  { %4099 = sst [smem:[#allocation16_spill]] %s4060_s4 }
   0x6   :  { %4100 = sst [smem:[#allocation17_spill]] %s4061_s5 }
   0x7   :  { %4101 = sst [smem:[#allocation18_spill]] %s4062_s6 }
   0x8   :  { %4102 = sst [smem:[#allocation19_spill]] %s4063_s7 }
   0x9   :  { %4103 = sst [smem:[#allocation20_spill]] %s4077_s21 }
   0xa   :  { %4104 = sst [smem:[#allocation21_spill]] %s4078_s22 }
   0xb   :  { %29 = vsyncpa [#allocation3], 0 }
   0xc   :  { %31 = vsyncpa [#allocation3 + $0x1], 0  ;;  %s3474_s4 = smov 0   ;;  %s3476_s30 = smov 0  }
   0xd   :  { %s3478_s24 = smov 0   ;;  %s3480_s25 = smov 0  }
   0xe LB: > { %4105 = sst [smem:[#allocation5_spill]] %s3339_s4  ;;  %s3495_s5 = sadd.s32 4294967295, %s3351_s25   ;;  %s3351_s25 = sphi %s3480_s25, %s4129_s25   ;;  %s3347_s24 = sphi %s3478_s24, %s4131_s24   ;;  %s3343_s30 = sphi %s3476_s30, %s4133_s30   ;;  %s3339_s4 = sphi %s3474_s4, %s4132_s4  }
   0xf   : > { %4106 = sst [smem:[#allocation6_spill]] %s3347_s24  ;;  %s2704_s1 = sadd.s32 4294967294, %s3351_s25  }
  0x10   : > { %4107 = sst [smem:[#allocation7_spill]] %s3351_s25  ;;  %s3499_s26 = sadd.s32 1, %s3351_s25  }
  0x11   : > { %4108 = sst [smem:[#allocation8_spill]] %s3499_s26  ;;  %s542_s2 = sadd.s32 1, %s3347_s24 }
  0x12   : > { %s539_s6 = ssub.s32 %s3351_s25, %s3499_s26  ;;  %p552_p0 = scmp.ne.s32.totalorder %s3347_s24, %s3343_s30 }
  0x13   : > { %p540_p1 = scmp.eq.s32.totalorder %s539_s6, 0  ;;  %p553_p2 = scmp.eq.s32.totalorder %s3495_s5, 1 }
  0x14   : > { %p558_p3 = scmp.ne.s32.totalorder %s3343_s30, %s3339_s4  ;;  %p559_p4 = scmp.eq.s32.totalorder %s2704_s1, 1 }
  0x15   : > { %s3510_s27 = scalar_select %p540_p1, %s3347_s24, %s542_s2  }
  0x16   : > { %p3512_p5 = por %p553_p2, %p552_p0  ;;  %p3516_p6 = por %p559_p4, %p558_p3 }
  0x17   : > { %4109 = sst [smem:[#allocation9_spill]] %s3510_s27  ;;  %p2707_p7 = scmp.ge.s32.totalorder %s3351_s25, 1 }
  0x18   : > { %s4110_s7 = scalar_select %p3512_p5, 1, 0 }
  0x19   : > { %s4112_s28 = scalar_select %p3516_p6, 1, 0 }
  0x1a   : > { %4111 = sst [smem:[#allocation10_spill]] %s4110_s7  ;;  %p650_p8 = scmp.lt.s32.totalorder %s3351_s25, 3 }
  0x1b   : > { %4113 = sst [smem:[#allocation11_spill]] %s4112_s28 }
  0x1c   : > { %p651_p9 = pnand %p2707_p7, %p650_p8 }
  0x1d   : > { %p720_p10 = scmp.lt.s32.totalorder (!%p651_p9), %s3495_s5, 1  ;;  %s4114_s2 = sld [smem:[#allocation12_spill]] (!%p651_p9) }
  0x1e   : > { %654 = sbr.rel (%p651_p9) target bundleno = 3758 (0xeae), region = 108  ;;  %s4115_s1 = sld [smem:[#allocation16_spill]] (!%p651_p9) }
  0x1f   : > { %s4116_s25 = sld [smem:[#allocation18_spill]] (!%p651_p9)  ;;  %s718_s26 = sand.u32 (!%p651_p9), 1, %s3343_s30  }
  0x20   : > { %s4119_s4 = sld [smem:[#allocation15_spill]] (!%p651_p9)  ;;  %s719_s27 = scalar_lea.vmem (!%p651_p9), [#allocation2], %s718_s26 }
  0x21   : > { %s4120_s22 = sld [smem:[#allocation21_spill]] (!%p651_p9) }
  0x22   : > { %s4121_s7 = sld [smem:[#allocation19_spill]] (!%p651_p9) }
  0x23   : > { %s3524_s29 = scalar_select %p720_p10, %s3495_s5, 1  ;;  %vm736_vm0 = vcmask 261120   ;;  %v3353_v2 = vmov 32.0   ;;  %v3115_v46 = vld [vmem:[%s4064_s8 + $0x8] sm:$0xff]  ;;  %v3117_v47 = vld [vmem:[%s4064_s8 + $0x18] sm:$0xff]  ;;  %v3114_v50 = vld [vmem:[%s4064_s8] sm:$0xff] }
  0x24   : > { %3241 = vrcp.f32 %v3353_v2  ;;  %v3099_v14 = vld [vmem:[%s4115_s1 + $0x8] sm:$0xff]  ;;  %v3101_v15 = vld [vmem:[%s4115_s1 + $0x18] sm:$0xff]  ;;  %v3098_v18 = vld [vmem:[%s4115_s1] sm:$0xff]  ;;  %vm1193_vm5 = vcmask 64512   ;;  %vm1325_vm6 = vcmask 1043456   ;;  %vm1611_vm10 = vcmask 523264  }
  0x25   : > { %s2708_s3 = sshll.u32 %s3524_s29, 3  ;;  %v3103_v16 = vld [vmem:[%s4115_s1 + $0x28] sm:$0xff]  ;;  %v3105_v17 = vld [vmem:[%s4115_s1 + $0x38] sm:$0xff]  ;;  %832 = vmatpush.bf16.msra.mxu0 %v3099_v14  ;;  %857 = vmatpush.bf16.msra.mxu1 %v3101_v15  ;;  %v3100_v19 = vld [vmem:[%s4115_s1 + $0x10] sm:$0xff]  ;;  %s4117_s28 = smov %s4116_s25 }
  0x26   : > { %s723_s6 = scalar_lea.vmem %s4114_s2, %s2708_s3  ;;  %882 = vmatpush.bf16.msra.mxu2 %v3103_v16  ;;  %907 = vmatpush.bf16.msra.mxu3 %v3105_v17  ;;  %v3102_v20 = vld [vmem:[%s4115_s1 + $0x20] sm:$0xff]  ;;  %v3104_v21 = vld [vmem:[%s4115_s1 + $0x30] sm:$0xff]  ;;  %v3107_v23 = vld [vmem:[%s4116_s25 + $0x8] sm:$0xff]  ;;  %s3160_s24 = smul.u32 24, %s3524_s29 }
  0x27   : > { %v733_v0 = vld [vmem:[%s723_s6] sm:$0xff]  ;;  %v3109_v24 = vld [vmem:[%s4117_s28 + $0x18] sm:$0xff]  ;;  %v3111_v25 = vld [vmem:[%s4117_s28 + $0x28] sm:$0xff]  ;;  %s4118_s6 = sld [smem:[#allocation14_spill]] }
  0x28   : > { %v737_v1 = vsel %vm736_vm0, %v733_v0, 0.0  ;;  %v3113_v27 = vld [vmem:[%s4117_s28 + $0x38] sm:$0xff]  ;;  %v3106_v28 = vld [vmem:[%s4117_s28] sm:$0xff]  ;;  %v3108_v29 = vld [vmem:[%s4117_s28 + $0x10] sm:$0xff]  ;;  %s3594_s3 = scalar_lea.vmem %s4120_s22, %s3160_s24  ;;  %s4123_s25 = sld [smem:[#allocation13_spill]] }
  0x29   : > { %738 = vadd.xlane.f32.xlu0 %v737_v1  ;;  %833 = vmatpush.bf16.msra.mxu0 %v3098_v18  ;;  %v3110_v31 = vld [vmem:[%s4117_s28 + $0x20] sm:$0xff]  ;;  %v3112_v32 = vld [vmem:[%s4117_s28 + $0x30] sm:$0xff]  ;;  %v3119_v48 = vld [vmem:[%s4064_s8 + $0x28] sm:$0xff]  ;;  %s4124_s21 = sld [smem:[#allocation20_spill]]  ;;  %s2613_s24 = sshll.u32 %s719_s27, 4  ;;  %s2614_s24 = int_to_ptr.vmem [resolvable:$true] %s2613_s24 }
  0x2a   : > { %v3242_v3 = vpop.eup %3241  ;;  %858 = vmatpush.bf16.msra.mxu1 %v3100_v19  ;;  %883 = vmatpush.bf16.msra.mxu2 %v3102_v20  ;;  %v3202_v41 = vld [vmem:[%s4119_s4] ss:$0 sm:$0xff]  ;;  %v3121_v49 = vld [vmem:[%s4064_s8 + $0x38] sm:$0xff]  ;;  %v3116_v51 = vld [vmem:[%s4064_s8 + $0x10] sm:$0xff] }
  0x2b   : > { %v741_v4 = vmul.f32 32.0, %v3242_v3  ;;  %vm745_vm1 = vweird.f32 %v3242_v3  ;;  %908 = vmatpush.bf16.msra.mxu3 %v3104_v21  ;;  %v3118_v52 = vld [vmem:[%s4064_s8 + $0x20] sm:$0xff]  ;;  %v3120_v53 = vld [vmem:[%s4064_s8 + $0x30] sm:$0xff] }
  0x2c   : > { %v3207_v60 = vld [vmem:[%s4121_s7] ss:$0 sm:$0xff]  ;;  %v3208_v61 = vld [vmem:[%s4121_s7 + $0x1] ss:$0 sm:$0xff] }
  0x2d   : > { %v742_v5 = vsub.f32 1.0, %v741_v4  ;;  %964 = vmatpush.bf16.msrb.mxu0 %v3107_v23  ;;  %v3201_v39 = vld [vmem:[%s4118_s6] ss:$0 sm:$0xff]  ;;  %s4122_s6 = sld [smem:[#allocation17_spill]] }
  0x2e   : > { %989 = vmatpush.bf16.msrb.mxu1 %v3109_v24  ;;  %1014 = vmatpush.bf16.msrb.mxu2 %v3111_v25  ;;  %s726_s0 = scalar_lea.vmem %s4123_s25, %s3524_s29  ;;  %s3309_s25 = scalar_lea.hbm %s4079_s23, 2 }
  0x2f   : > { %v743_v6 = vmul.f32 %v3242_v3, %v742_v5  ;;  %1039 = vmatpush.bf16.msrb.mxu3 %v3113_v27 }
  0x31   : > { %v744_v7 = vadd.f32 %v3242_v3, %v743_v6  ;;  %965 = vmatpush.bf16.msrb.mxu0 %v3106_v28 }
  0x32   : > { %990 = vmatpush.bf16.msrb.mxu1 %v3108_v29  ;;  %1015 = vmatpush.bf16.msrb.mxu2 %v3110_v31 }
  0x33   : > { %v3531_v8 = vsel %vm745_vm1, %v3242_v3, %v744_v7  ;;  %1040 = vmatpush.bf16.msrb.mxu3 %v3112_v32  ;;  %v3204_v1 = vld [vmem:[%s4122_s6 + $0x1] ss:$0 sm:$0xff]  ;;  %v3205_v15 = vld [vmem:[%s4122_s6 + $0x2] ss:$0 sm:$0xff]  ;;  %v3206_v16 = vld [vmem:[%s4122_s6 + $0x3] ss:$0 sm:$0xff] }
  0x9c   : > { %v739_v9 = vpop.xlane.xlu0 %738 }
  0x9d   : > { %v747_v10 = vmul.f32 %v3531_v8, %v739_v9 }
  0x9f   : > { %v748_v11 = vsub.f32 %v733_v0, %v747_v10  ;;  %v3203_v0 = vld [vmem:[%s4122_s6] ss:$0 sm:$0xff] }
  0xa1   : > { %v749_v12 = vmul.f32 %v748_v11, %v748_v11 }
  0xa3   : > { %v750_v13 = vsel %vm736_vm0, %v749_v12, 0.0  ;;  %v3210_v12 = vld [vmem:[%s4121_s7 + $0x3] ss:$0 sm:$0xff] }
  0xa4   : > { %751 = vadd.xlane.f32.xlu0 %v750_v13 }
 0x117   : > { %v752_v22 = vpop.xlane.xlu0 %751 }
 0x118   : > { %v753_v26 = vmul.f32 %v752_v22, %v3531_v8 }
 0x11a   : > { %v754_v30 = vadd.f32 1e-12, %v753_v26 }
 0x11c   : > { %3243 = vrsqrt.f32 %v754_v30  ;;  %vm761_vm3 = vweird.f32 %v754_v30 }
 0x122   : > { %v3244_v33 = vpop.eup %3243 }
 0x123   : > { %v756_v34 = vmul.f32 %v3244_v33, %v754_v30  ;;  %vm762_vm2 = vweird.f32 %v3244_v33 }
 0x124   : > { %vm763_vm4 = vmor %vm761_vm3, %vm762_vm2 }
 0x125   : > { %v757_v35 = vmul.f32 %v3244_v33, %v756_v34  ;;  %v3212_v34 = vld [vmem:[%s4065_s9 + $0x1] ss:$0 sm:$0xff] }
 0x127   : > { %v758_v36 = vmul.f32 0.5, %v757_v35 }
 0x129   : > { %v759_v37 = vsub.f32 1.5, %v758_v36 }
 0x12b   : > { %v760_v38 = vmul.f32 %v3244_v33, %v759_v37 }
 0x12d   : > { %v764_v40 = vsel %vm763_vm4, %v3244_v33, %v760_v38  ;;  %v3211_v33 = vld [vmem:[%s4065_s9] ss:$0 sm:$0xff] }
 0x12e   : > { %v765_v42 = vmul.f32 %v764_v40, %v748_v11  ;;  %v3209_v11 = vld [vmem:[%s4121_s7 + $0x2] ss:$0 sm:$0xff] }
 0x130   : > { %v769_v43 = vmul.f32 %v3201_v39, %v765_v42 }
 0x132   : > { %v3596_v44 = vadd.f32 %v3202_v41, %v769_v43 }
 0x134   : > { %774 = vst.msk [vmem:[%s3594_s3] sm:$0xff] %vm736_vm0, %v3596_v44  ;;  %v778_v45 = vpack.c.bf16 %v3596_v44, %v3596_v44 }
 0x136   : > { %2718 = vmatmul.msk.bf16.vlgmr.msra.gmra.mxu0 %vm736_vm0, %v778_v45  ;;  %2727 = vmatmul.msk.bf16.vlgmr.msra.gmra.mxu1 %vm736_vm0, %v778_v45 }
 0x137   : > { %2736 = vmatmul.msk.bf16.vlgmr.msra.gmra.mxu2 %vm736_vm0, %v778_v45  ;;  %2745 = vmatmul.msk.bf16.vlgmr.msra.gmra.mxu3 %vm736_vm0, %v778_v45 }
 0x138   : > { %1096 = vmatpush.bf16.msra.mxu0 %v3115_v46  ;;  %1121 = vmatpush.bf16.msra.mxu1 %v3117_v47 }
 0x139   : > { %1146 = vmatpush.bf16.msra.mxu2 %v3119_v48  ;;  %1171 = vmatpush.bf16.msra.mxu3 %v3121_v49  ;;  %v3213_v48 = vld [vmem:[%s4065_s9 + $0x2] ss:$0 sm:$0xff]  ;;  %v3214_v49 = vld [vmem:[%s4065_s9 + $0x3] ss:$0 sm:$0xff] }
 0x13c   : > { %1097 = vmatpush.bf16.msra.mxu0 %v3114_v50  ;;  %1122 = vmatpush.bf16.msra.mxu1 %v3116_v51 }
 0x13d   : > { %1147 = vmatpush.bf16.msra.mxu2 %v3118_v52  ;;  %1172 = vmatpush.bf16.msra.mxu3 %v3120_v53 }
 0x146   : > { %2754 = vmatmul.msk.bf16.vlgmr.msrb.gmra.mxu0 %vm736_vm0, %v778_v45  ;;  %2763 = vmatmul.msk.bf16.vlgmr.msrb.gmra.mxu1 %vm736_vm0, %v778_v45 }
 0x147   : > { %2772 = vmatmul.msk.bf16.vlgmr.msrb.gmra.mxu2 %vm736_vm0, %v778_v45  ;;  %2781 = vmatmul.msk.bf16.vlgmr.msrb.gmra.mxu3 %vm736_vm0, %v778_v45 }
 0x156   : > { %2790 = vmatmul.msk.bf16.vlgmr.msra.gmra.mxu0 %vm736_vm0, %v778_v45  ;;  %2799 = vmatmul.msk.bf16.vlgmr.msra.gmra.mxu1 %vm736_vm0, %v778_v45 }
 0x157   : > { %2808 = vmatmul.msk.bf16.vlgmr.msra.gmra.mxu2 %vm736_vm0, %v778_v45  ;;  %2817 = vmatmul.msk.bf16.vlgmr.msra.gmra.mxu3 %vm736_vm0, %v778_v45 }
 0x1b3   : > { %v835_v54 = vpop.f32.mrf.mxu0  ;;  %v860_v55 = vpop.f32.mrf.mxu1 }
 0x1b4   : > { %v836_v9 = vadd.f32 %v3203_v0, %v835_v54  ;;  %v861_v10 = vadd.f32 %v3204_v1, %v860_v55  ;;  %v775_v0 = vld [vmem:[%s726_s0] sm:$0x1]  ;;  %s2611_s0 = scalar_lea.hbm %s4079_s23, %s3495_s5 }
 0x1b5   : > { %v776_v1 = vsub.f32 1.0, %v775_v0  ;;  %v1406_v0 = vld [vmem:[%s4066_s10 + $0xc] sm:$0xf] }
 0x1b6   : > { %v1178_v19 = vmul.f32 0.35355338, %v836_v9  ;;  %v1179_v20 = vmul.f32 0.35355338, %v861_v10 }
 0x1b8   : > { %v1182_v29 = vpack.c.bf16 %v1178_v19, %v1178_v19  ;;  %v1183_v30 = vpack.c.bf16 %v1179_v20, %v1179_v20 }
 0x1ba   : > { %v885_v56 = vpop.f32.mrf.mxu2  ;;  %v910_v57 = vpop.f32.mrf.mxu3 }
 0x1bb   : > { %v837_v58 = vpop.f32.mrf.mxu0  ;;  %v862_v59 = vpop.f32.mrf.mxu1  ;;  %v886_v25 = vadd.f32 %v3205_v15, %v885_v56  ;;  %v911_v26 = vadd.f32 %v3206_v16, %v910_v57 }
 0x1bd   : > { %v1180_v35 = vmul.f32 0.35355338, %v886_v25  ;;  %v1181_v36 = vmul.f32 0.35355338, %v911_v26 }
 0x1bf   : > { %v1184_v43 = vpack.c.bf16 %v1180_v35, %v1180_v35  ;;  %v1185_v45 = vpack.c.bf16 %v1181_v36, %v1181_v36 }
 0x1c2   : > { %v887_v62 = vpop.f32.mrf.mxu2  ;;  %v912_v63 = vpop.f32.mrf.mxu3 }
 0x1c3   : > { %v967_v2 = vpop.f32.mrf.mxu0  ;;  %v992_v3 = vpop.f32.mrf.mxu1 }
 0x1c4   : > { %v968_v4 = vadd.f32 %v3207_v60, %v967_v2  ;;  %v993_v5 = vadd.f32 %v3208_v61, %v992_v3  ;;  %v777_v2 = vmul.f32 -1e+09, %v776_v1  ;;  %v1468_v1 = vsel %vm1325_vm6, %v1406_v0, 0 }
 0x1c6   : > { %v1186_v6 = vpack.c.bf16 %v968_v4, %v968_v4  ;;  %v1187_v7 = vpack.c.bf16 %v993_v5, %v993_v5  ;;  %v3691_v3 = vperm.slane %v777_v2, 0 }
 0x1c8   : > { %v1198_v13 = vsel %vm1193_vm5, %v1186_v6, 0  ;;  %v1217_v14 = vsel %vm1193_vm5, %v1187_v7, 0 }
 0x1c9   : > { %1207 = vmatpush.bf16.xpose.msrb.mxu0 %v1198_v13  ;;  %1226 = vmatpush.bf16.xpose.msrb.mxu1 %v1217_v14 }
 0x1ca   : > { %v1017_v17 = vpop.f32.mrf.mxu2  ;;  %v1042_v18 = vpop.f32.mrf.mxu3 }
 0x1cb   : > { %v1018_v21 = vadd.f32 %v3209_v11, %v1017_v17  ;;  %v1043_v22 = vadd.f32 %v3210_v12, %v1042_v18  ;;  %v969_v23 = vpop.f32.mrf.mxu0  ;;  %v994_v24 = vpop.f32.mrf.mxu1 }
 0x1cd   : > { %v1188_v27 = vpack.c.bf16 %v1018_v21, %v1018_v21  ;;  %v1189_v28 = vpack.c.bf16 %v1043_v22, %v1043_v22 }
 0x1cf   : > { %v1236_v31 = vsel %vm1193_vm5, %v1188_v27, 0  ;;  %v1255_v32 = vsel %vm1193_vm5, %v1189_v28, 0 }
 0x1d0   : > { %1245 = vmatpush.bf16.xpose.msrb.mxu2 %v1236_v31  ;;  %1264 = vmatpush.bf16.xpose.msrb.mxu3 %v1255_v32 }
 0x1d1   : > { %2818 = vmatmul.msk.bf16.vlgmr.msrb.gmra.mxu0 %vm1193_vm5, %v1182_v29  ;;  %2819 = vmatmul.msk.bf16.vlgmr.msrb.gmra.mxu1 %vm1193_vm5, %v1183_v30 }
 0x1d2   : > { %v1019_v37 = vpop.f32.mrf.mxu2  ;;  %v1044_v38 = vpop.f32.mrf.mxu3 }
 0x1d3   : > { %v1099_v39 = vpop.f32.mrf.mxu0  ;;  %v1124_v40 = vpop.f32.mrf.mxu1 }
 0x1d4   : > { %v1100_v41 = vadd.f32 %v3211_v33, %v1099_v39  ;;  %v1125_v42 = vadd.f32 %v3212_v34, %v1124_v40 }
 0x1d6   : > { %v1318_v46 = vpack.c.bf16 %v1100_v41, %v1100_v41  ;;  %v1319_v47 = vpack.c.bf16 %v1125_v42, %v1125_v42 }
 0x1d7   : > { %2820 = vmatmul.msk.bf16.vlgmr.msrb.gmra.mxu2 %vm1193_vm5, %v1184_v43  ;;  %2821 = vmatmul.msk.bf16.vlgmr.msrb.gmra.mxu3 %vm1193_vm5, %v1185_v45 }
 0x1d8   : > { %v1327_v50 = vsel %vm1325_vm6, %v1318_v46, 0  ;;  %v1346_v51 = vsel %vm1325_vm6, %v1319_v47, 0 }
 0x1d9   : > { %1336 = vmatpush.bf16.msra.mxu0 %v1327_v50  ;;  %1355 = vmatpush.bf16.msra.mxu1 %v1346_v51 }
 0x1da   : > { %v1149_v52 = vpop.f32.mrf.mxu2  ;;  %v1174_v53 = vpop.f32.mrf.mxu3 }
 0x1db   : > { %v1150_v54 = vadd.f32 %v3213_v48, %v1149_v52  ;;  %v1175_v55 = vadd.f32 %v3214_v49, %v1174_v53  ;;  %v1101_v56 = vpop.f32.mrf.mxu0  ;;  %v1126_v57 = vpop.f32.mrf.mxu1 }
 0x1dd   : > { %v1320_v58 = vpack.c.bf16 %v1150_v54, %v1150_v54  ;;  %v1321_v59 = vpack.c.bf16 %v1175_v55, %v1175_v55 }
 0x1df   : > { %v1365_v60 = vsel %vm1325_vm6, %v1320_v58, 0  ;;  %v1384_v61 = vsel %vm1325_vm6, %v1321_v59, 0  ;;  %v1403_v58 = vld [vmem:[%s4066_s10] sm:$0xf] }
 0x1e0   : > { %1374 = vmatpush.bf16.msra.mxu2 %v1365_v60  ;;  %1393 = vmatpush.bf16.msra.mxu3 %v1384_v61  ;;  %v1411_v59 = vsel %vm1325_vm6, %v1403_v58, 0  ;;  %v1405_v60 = vld [vmem:[%s4066_s10 + $0x8] sm:$0xf]  ;;  %v3127_v58 = vld [vmem:[%s4072_s16 + $0x18] sm:$0xff] }
 0x1e1   : > { %1420 = vmatpush.bf16.msrb.mxu0 %v1411_v59  ;;  %v1449_v61 = vsel %vm1325_vm6, %v1405_v60, 0  ;;  %v3126_v59 = vld [vmem:[%s4072_s16 + $0x10] sm:$0xff]  ;;  %v3125_v60 = vld [vmem:[%s4072_s16 + $0x8] sm:$0xff] }
 0x1e2   : > { %v1151_v62 = vpop.f32.mrf.mxu2  ;;  %v1176_v63 = vpop.f32.mrf.mxu3 }
 0x1e3   : > { %v1404_v62 = vld [vmem:[%s4066_s10 + $0x4] sm:$0xf] }
 0x1e4   : > { %1458 = vmatpush.bf16.msrb.mxu2 %v1449_v61  ;;  %v1430_v63 = vsel %vm1325_vm6, %v1404_v62, 0  ;;  %1477 = vmatpush.bf16.msrb.mxu3 %v1468_v1  ;;  %v3124_v61 = vld [vmem:[%s4072_s16] sm:$0xff] }
 0x1e5   : > { %1439 = vmatpush.bf16.msrb.mxu1 %v1430_v63  ;;  %v3218_v62 = vld [vmem:[%s4071_s15] ss:$0 sm:$0xff] }
 0x24e   : > { %v1209_v4 = vpop.f32.mrf.mxu0  ;;  %v1228_v5 = vpop.f32.mrf.mxu1 }
 0x24f   : > { %v1210_v6 = vadd.f32 %v1209_v4, %v3691_v3  ;;  %v1229_v9 = vadd.f32 %v1228_v5, %v3691_v3 }
 0x251   : > { %v1270_v7 = vsel %vm1193_vm5, %v1210_v6, -inf  ;;  %v1273_v12 = vsel %vm1193_vm5, %v1229_v9, -inf }
 0x252   : > { %1271 = vmax.xlane.f32.xlu2 %v1270_v7 }
 0x256   : > { %v1211_v10 = vpop.f32.mrf.mxu0  ;;  %v1230_v11 = vpop.f32.mrf.mxu1 }
 0x25a   : > { %v1247_v13 = vpop.f32.mrf.mxu2  ;;  %v1266_v14 = vpop.f32.mrf.mxu3  ;;  %1274 = vmax.xlane.f32.xlu2 %v1273_v12 }
 0x25b   : > { %v1248_v15 = vadd.f32 %v1247_v13, %v3691_v3  ;;  %v1267_v17 = vadd.f32 %v1266_v14, %v3691_v3 }
 0x25d   : > { %v1276_v16 = vsel %vm1193_vm5, %v1248_v15, -inf  ;;  %v1279_v20 = vsel %vm1193_vm5, %v1267_v17, -inf }
 0x25e   : > { %1277 = vmax.xlane.f32.xlu1 %v1276_v16 }
 0x262   : > { %v1249_v18 = vpop.f32.mrf.mxu2  ;;  %v1268_v19 = vpop.f32.mrf.mxu3 }
 0x266   : > { %1280 = vmax.xlane.f32.xlu1 %v1279_v20 }
 0x2c5   : > { %v1272_v21 = vpop.xlane.xlu2 %1271 }
 0x2c6   : > { %v1282_v22 = vsub.f32 %v1210_v6, %v1272_v21 }
 0x2c8   : > { %v1286_v23 = vmul.f32 1.442695, %v1282_v22 }
 0x2ca   : > { %3245 = vpow2.f32 %v1286_v23 }
 0x2cd   : > { %v1275_v25 = vpop.xlane.xlu2 %1274 }
 0x2ce   : > { %v1283_v29 = vsub.f32 %v1229_v9, %v1275_v25 }
 0x2d0   : > { %v3246_v24 = vpop.eup %3245  ;;  %v1288_v31 = vmul.f32 1.442695, %v1283_v29 }
 0x2d1   : > { %v1278_v26 = vpop.xlane.xlu1 %1277  ;;  %v1294_v27 = vsel %vm1193_vm5, %v3246_v24, 0.0 }
 0x2d2   : > { %v1284_v28 = vsub.f32 %v1248_v15, %v1278_v26  ;;  %1295 = vadd.xlane.f32.xlu2 %v1294_v27 }
 0x2d4   : > { %v1290_v30 = vmul.f32 1.442695, %v1284_v28  ;;  %v3215_v28 = vld [vmem:[%s4067_s11] ss:$0 sm:$0xff] }
 0x2d6   : > { %3247 = vpow2.f32 %v1290_v30 }
 0x2d7   : > { %3249 = vpow2.f32 %v1288_v31 }
 0x2d9   : > { %v1281_v32 = vpop.xlane.xlu1 %1280 }
 0x2da   : > { %v1285_v33 = vsub.f32 %v1267_v17, %v1281_v32 }
 0x2dc   : > { %v3248_v34 = vpop.eup %3247  ;;  %v1292_v35 = vmul.f32 1.442695, %v1285_v33 }
 0x2dd   : > { %v1300_v36 = vsel %vm1193_vm5, %v3248_v34, 0.0  ;;  %v3250_v37 = vpop.eup %3249 }
 0x2de   : > { %3251 = vpow2.f32 %v1292_v35  ;;  %1301 = vadd.xlane.f32.xlu0 %v1300_v36  ;;  %v1297_v40 = vsel %vm1193_vm5, %v3250_v37, 0.0 }
 0x2e4   : > { %v3252_v38 = vpop.eup %3251 }
 0x2e5   : > { %v1303_v39 = vsel %vm1193_vm5, %v3252_v38, 0.0 }
 0x2e6   : > { %1304 = vadd.xlane.f32.xlu1 %v1303_v39  ;;  %1298 = vadd.xlane.f32.xlu0 %v1297_v40  ;;  %v3123_v40 = vld [vmem:[%s4070_s14 + $0x8] sm:$0xff] }
 0x345   : > { %v1296_v41 = vpop.xlane.xlu2 %1295 }
 0x346   : > { %3253 = vrcp.f32 %v1296_v41 }
 0x34c   : > { %v3254_v42 = vpop.eup %3253 }
 0x34d   : > { %v1310_v43 = vmul.f32 %v3254_v42, %v3246_v24 }
 0x34f   : > { %v1314_v45 = vpack.c.bf16 %v1310_v43, %v1310_v43 }
 0x351   : > { %v1302_v46 = vpop.xlane.xlu0 %1301  ;;  %2822 = vmatmul.msk.bf16.vlgmr.msra.gmra.mxu0 %vm1193_vm5, %v1314_v45 }
 0x352   : > { %3255 = vrcp.f32 %v1302_v46  ;;  %1558 = vmatpush.bf16.msra.mxu0 %v3123_v40  ;;  %v3138_v40 = vld [vmem:[%s4117_s28 + $0x50] sm:$0xff] }
 0x358   : > { %v3256_v47 = vpop.eup %3255 }
 0x359   : > { %v1312_v48 = vmul.f32 %v3256_v47, %v3248_v34  ;;  %v1305_v49 = vpop.xlane.xlu1 %1304  ;;  %v1299_v50 = vpop.xlane.xlu0 %1298 }
 0x35a   : > { %3257 = vrcp.f32 %v1305_v49 }
 0x35b   : > { %v1316_v51 = vpack.c.bf16 %v1312_v48, %v1312_v48  ;;  %3259 = vrcp.f32 %v1299_v50 }
 0x35d   : > { %2824 = vmatmul.msk.bf16.vlgmr.msra.gmra.mxu2 %vm1193_vm5, %v1316_v51  ;;  %v3216_v51 = vld [vmem:[%s4068_s12] ss:$0 sm:$0xff] }
 0x360   : > { %v3258_v52 = vpop.eup %3257 }
 0x361   : > { %v3260_v53 = vpop.eup %3259  ;;  %v1313_v54 = vmul.f32 %v3258_v52, %v3252_v38 }
 0x362   : > { %v1311_v55 = vmul.f32 %v3260_v53, %v3250_v37  ;;  %v3217_v53 = vld [vmem:[%s4069_s13] ss:$0 sm:$0xff] }
 0x363   : > { %v1317_v56 = vpack.c.bf16 %v1313_v54, %v1313_v54 }
 0x364   : > { %v1315_v57 = vpack.c.bf16 %v1311_v55, %v1311_v55 }
 0x365   : > { %2825 = vmatmul.msk.bf16.vlgmr.msra.gmra.mxu3 %vm1193_vm5, %v1317_v56 }
 0x366   : > { %2823 = vmatmul.msk.bf16.vlgmr.msra.gmra.mxu1 %vm1193_vm5, %v1315_v57 }
 0x367   : > { %1619 = vmatpush.bf16.msra.mxu1 %v3127_v58  ;;  %v3147_v58 = vld [vmem:[%s4064_s8 + $0x58] sm:$0xff] }
 0x36b   : > { %1620 = vmatpush.bf16.msra.mxu1 %v3126_v59  ;;  %v3149_v59 = vld [vmem:[%s4064_s8 + $0x68] sm:$0xff] }
 0x36f   : > { %1621 = vmatpush.bf16.msra.mxu1 %v3125_v60  ;;  %v3151_v60 = vld [vmem:[%s4064_s8 + $0x78] sm:$0xff] }
 0x373   : > { %1622 = vmatpush.bf16.msra.mxu1 %v3124_v61  ;;  %v3144_v61 = vld [vmem:[%s4064_s8 + $0x40] sm:$0xff] }
 0x3ce   : > { %v1338_v2 = vpop.f32.mrf.mxu0 }
 0x3cf   : > { %v1399_v4 = vpack.c.bf16 %v1338_v2, %v1338_v2 }
 0x3d1   : > { %2826 = vmatmul.msk.bf16.vlgmr.msrb.gmra.mxu0 %vm1193_vm5, %v1399_v4 }
 0x3d6   : > { %v1340_v5 = vpop.f32.mrf.mxu0 }
 0x3e0   : > { %v1376_v6 = vpop.f32.mrf.mxu2 }
 0x3e1   : > { %v1401_v7 = vpack.c.bf16 %v1376_v6, %v1376_v6 }
 0x3e3   : > { %v1357_v9 = vpop.f32.mrf.mxu1  ;;  %2828 = vmatmul.msk.bf16.vlgmr.msrb.gmra.mxu2 %vm1193_vm5, %v1401_v7 }
 0x3e4   : > { %v1400_v10 = vpack.c.bf16 %v1357_v9, %v1357_v9 }
 0x3e6   : > { %2827 = vmatmul.msk.bf16.vlgmr.msrb.gmra.mxu1 %vm1193_vm5, %v1400_v10 }
 0x3e8   : > { %v1378_v11 = vpop.f32.mrf.mxu2  ;;  %v1395_v12 = vpop.f32.mrf.mxu3 }
 0x3e9   : > { %v1402_v13 = vpack.c.bf16 %v1395_v12, %v1395_v12 }
 0x3eb   : > { %v1359_v14 = vpop.f32.mrf.mxu1  ;;  %2829 = vmatmul.msk.bf16.vlgmr.msrb.gmra.mxu3 %vm1193_vm5, %v1402_v13 }
 0x3ec   : > { %v3219_v14 = vld [vmem:[%s4073_s17] ss:$0 sm:$0xff] }
 0x3f0   : > { %v1397_v15 = vpop.f32.mrf.mxu3 }
 0x44e   : > { %v1422_v16 = vpop.f32.mrf.mxu0 }
 0x44f   : > { %v1483_v21 = vsel %vm736_vm0, %v1422_v16, 0.0 }
 0x456   : > { %v1424_v17 = vpop.f32.mrf.mxu0 }
 0x463   : > { %v1441_v18 = vpop.f32.mrf.mxu1 }
 0x464   : > { %v1484_v20 = vsel %vm736_vm0, %v1441_v18, 0.0 }
 0x465   : > { %v1485_v24 = vadd.f32 %v1484_v20, %v1483_v21 }
 0x466   : > { %v1460_v19 = vpop.f32.mrf.mxu2 }
 0x467   : > { %v1486_v22 = vsel %vm736_vm0, %v1460_v19, 0.0 }
 0x468   : > { %v1487_v25 = vadd.f32 %v1486_v22, %v1485_v24 }
 0x46b   : > { %v1443_v23 = vpop.f32.mrf.mxu1 }
 0x46e   : > { %v1462_v26 = vpop.f32.mrf.mxu2  ;;  %v1479_v27 = vpop.f32.mrf.mxu3 }
 0x46f   : > { %v1488_v29 = vsel %vm736_vm0, %v1479_v27, 0.0  ;;  %v3131_v26 = vld [vmem:[%s4115_s1 + $0x58] sm:$0xff]  ;;  %v3133_v27 = vld [vmem:[%s4115_s1 + $0x68] sm:$0xff] }
 0x470   : > { %v1489_v30 = vadd.f32 %v1488_v29, %v1487_v25  ;;  %v3129_v25 = vld [vmem:[%s4115_s1 + $0x48] sm:$0xff]  ;;  %1744 = vmatpush.bf16.msra.mxu3 %v3131_v26  ;;  %v3128_v29 = vld [vmem:[%s4115_s1 + $0x40] sm:$0xff] }
 0x471   : > { %1719 = vmatpush.bf16.msra.mxu2 %v3129_v25  ;;  %v3224_v25 = vld [vmem:[%s4122_s6 + $0x4] ss:$0 sm:$0xff]  ;;  %v3225_v26 = vld [vmem:[%s4122_s6 + $0x5] ss:$0 sm:$0xff] }
 0x472   : > { %v1494_v31 = vadd.f32 %v3215_v28, %v1489_v30  ;;  %v3135_v28 = vld [vmem:[%s4115_s1 + $0x78] sm:$0xff]  ;;  %v3130_v30 = vld [vmem:[%s4115_s1 + $0x50] sm:$0xff] }
 0x473   : > { %1794 = vmatpush.bf16.msrb.mxu1 %v3135_v28 }
 0x474   : > { %v1495_v32 = vadd.f32 %v1494_v31, %v3596_v44  ;;  %v3122_v44 = vld [vmem:[%s4070_s14] sm:$0xff]  ;;  %1745 = vmatpush.bf16.msra.mxu3 %v3130_v30 }
 0x475   : > { %1559 = vmatpush.bf16.msra.mxu0 %v3122_v44  ;;  %v3132_v31 = vld [vmem:[%s4115_s1 + $0x60] sm:$0xff]  ;;  %1720 = vmatpush.bf16.msra.mxu2 %v3128_v29 }
 0x476   : > { %v1481_v33 = vpop.f32.mrf.mxu3  ;;  %v1498_v34 = vsel %vm736_vm0, %v1495_v32, 0.0 }
 0x477   : > { %1499 = vadd.xlane.f32.xlu1 %v1498_v34  ;;  %v3137_v34 = vld [vmem:[%s4117_s28 + $0x48] sm:$0xff] }
 0x479   : > { %1769 = vmatpush.bf16.msrb.mxu0 %v3133_v27  ;;  %1853 = vmatpush.bf16.msrb.mxu2 %v3137_v34 }
 0x47d   : > { %1770 = vmatpush.bf16.msrb.mxu0 %v3132_v31 }
 0x4ea   : > { %v1500_v35 = vpop.xlane.xlu1 %1499 }
 0x4eb   : > { %v1501_v36 = vmul.f32 %v1500_v35, %v3531_v8  ;;  %v3139_v35 = vld [vmem:[%s4117_s28 + $0x58] sm:$0xff] }
 0x4ec   : > { %1878 = vmatpush.bf16.msrb.mxu3 %v3139_v35 }
 0x4ed   : > { %v1502_v37 = vsub.f32 %v1495_v32, %v1501_v36  ;;  %v3134_v32 = vld [vmem:[%s4115_s1 + $0x70] sm:$0xff]  ;;  %v3141_v36 = vld [vmem:[%s4117_s28 + $0x68] sm:$0xff]  ;;  %s2615_s1 = sshll.u32 %s2611_s0, 4  ;;  %s2616_s1 = int_to_ptr.hbm [resolvable:$true] %s2615_s1 }
 0x4ee   : > { %1795 = vmatpush.bf16.msrb.mxu1 %v3134_v32 }
 0x4ef   : > { %v1503_v38 = vmul.f32 %v1502_v37, %v1502_v37 }
 0x4f0   : > { %1879 = vmatpush.bf16.msrb.mxu3 %v3138_v40 }
 0x4f1   : > { %v1504_v39 = vsel %vm736_vm0, %v1503_v38, 0.0  ;;  %v3143_v38 = vld [vmem:[%s4117_s28 + $0x78] sm:$0xff] }
 0x4f2   : > { %1505 = vadd.xlane.f32.xlu2 %v1504_v39  ;;  %v3136_v39 = vld [vmem:[%s4117_s28 + $0x40] sm:$0xff] }
 0x4f3   : > { %1854 = vmatpush.bf16.msrb.mxu2 %v3136_v39 }
 0x565   : > { %v1506_v41 = vpop.xlane.xlu2 %1505 }
 0x566   : > { %v1507_v42 = vmul.f32 %v1506_v41, %v3531_v8  ;;  %v3140_v41 = vld [vmem:[%s4117_s28 + $0x60] sm:$0xff] }
 0x568   : > { %v1508_v43 = vadd.f32 1e-12, %v1507_v42  ;;  %v3142_v42 = vld [vmem:[%s4117_s28 + $0x70] sm:$0xff] }
 0x56a   : > { %3261 = vrsqrt.f32 %v1508_v43  ;;  %vm1515_vm8 = vweird.f32 %v1508_v43 }
 0x570   : > { %v3262_v45 = vpop.eup %3261 }
 0x571   : > { %v1510_v46 = vmul.f32 %v3262_v45, %v1508_v43  ;;  %vm1516_vm7 = vweird.f32 %v3262_v45 }
 0x572   : > { %vm1517_vm9 = vmor %vm1515_vm8, %vm1516_vm7 }
 0x573   : > { %v1511_v47 = vmul.f32 %v3262_v45, %v1510_v46 }
 0x575   : > { %v1512_v48 = vmul.f32 0.5, %v1511_v47 }
 0x577   : > { %v1513_v49 = vsub.f32 1.5, %v1512_v48 }
 0x579   : > { %v1514_v50 = vmul.f32 %v3262_v45, %v1513_v49 }
 0x57b   : > { %v1518_v52 = vsel %vm1517_vm9, %v3262_v45, %v1514_v50  ;;  %v3220_v50 = vld [vmem:[%s4074_s18] ss:$0 sm:$0xff] }
 0x57c   : > { %v1519_v54 = vmul.f32 %v1518_v52, %v1502_v37  ;;  %v3221_v52 = vld [vmem:[%s4075_s19] ss:$0 sm:$0xff] }
 0x57e   : > { %v1523_v55 = vmul.f32 %v3216_v51, %v1519_v54 }
 0x580   : > { %v1527_v56 = vadd.f32 %v3217_v53, %v1523_v55 }
 0x582   : > { %v1528_v57 = vpack.c.bf16 %v1527_v56, %v1527_v56 }
 0x584   : > { %2838 = vmatmul.msk.bf16.vlgmr.msra.gmra.mxu0 %vm736_vm0, %v1528_v57  ;;  %v3145_v57 = vld [vmem:[%s4064_s8 + $0x48] sm:$0xff] }
 0x585   : > { %1903 = vmatpush.bf16.msra.mxu0 %v3141_v36 }
 0x589   : > { %1904 = vmatpush.bf16.msra.mxu0 %v3140_v41 }
 0x601   : > { %v1561_v63 = vpop.f32.mrf.mxu0 }
 0x602   : > { %v1562_v0 = vadd.f32 %v3218_v62, %v1561_v63  ;;  %v3146_v62 = vld [vmem:[%s4064_s8 + $0x50] sm:$0xff]  ;;  %v3148_v63 = vld [vmem:[%s4064_s8 + $0x60] sm:$0xff] }
 0x604   : > { %v1566_v1 = vmul.f32 0.044715, %v1562_v0  ;;  %v1565_v10 = vmul.f32 0.5, %v1562_v0 }
 0x606   : > { %v1567_v2 = vmul.f32 %v1566_v1, %v1562_v0 }
 0x608   : > { %v1568_v4 = vmul.f32 %v1567_v2, %v1562_v0 }
 0x609   : > { %v1563_v5 = vpop.f32.mrf.mxu0 }
 0x60a   : > { %v1569_v6 = vadd.f32 %v1568_v4, %v1562_v0  ;;  %v3150_v0 = vld [vmem:[%s4064_s8 + $0x70] sm:$0xff] }
 0x60c   : > { %v1570_v7 = vmul.f32 0.7978846, %v1569_v6 }
 0x60e   : > { %3263 = vtanh.f32 %v1570_v7 }
 0x614   : > { %v3264_v9 = vpop.eup %3263 }
 0x615   : > { %v1572_v11 = vadd.f32 1.0, %v3264_v9 }
 0x617   : > { %v1573_v12 = vmul.f32 %v1572_v11, %v1565_v10  ;;  %v3226_v11 = vld [vmem:[%s4121_s7 + $0x6] ss:$0 sm:$0xff] }
 0x619   : > { %v1574_v13 = vpack.c.bf16 %v1573_v12, %v1573_v12  ;;  %v3227_v12 = vld [vmem:[%s4121_s7 + $0x7] ss:$0 sm:$0xff] }
 0x61b   : > { %2855 = vmatmul.msk.bf16.vlgmr.msra.gmra.mxu1 %vm1611_vm10, %v1574_v13  ;;  %v3222_v13 = vld [vmem:[%s4122_s6 + $0x6] ss:$0 sm:$0xff] }
 0x61c   : > { %1928 = vmatpush.bf16.msra.mxu1 %v3143_v38 }
 0x620   : > { %1929 = vmatpush.bf16.msra.mxu1 %v3142_v42 }
 0x698   : > { %v1624_v15 = vpop.f32.mrf.mxu1 }
 0x699   : > { %v1625_v16 = vadd.f32 %v3219_v14, %v1624_v15  ;;  %v3223_v14 = vld [vmem:[%s4122_s6 + $0x7] ss:$0 sm:$0xff]  ;;  %s3303_s6 = sshra.s32 %s2616_s1, 4  ;;  %s3304_s6 = int_to_ptr.hbm [resolvable:$true] %s3303_s6 }
 0x69a   : > { %p3310_p0 = scmp.lt.s32.totalorder %s3304_s6, %s4079_s23 }
 0x69b   : > { %v1628_v17 = vadd.f32 %v1625_v16, %v1527_v56 }
 0x69d   : > { %v1631_v18 = vsel %vm736_vm0, %v1628_v17, 0.0 }
 0x69e   : > { %1632 = vadd.xlane.f32.xlu0 %v1631_v18 }
 0x6a0   : > { %v1626_v19 = vpop.f32.mrf.mxu1 }
 0x6a1   : > { %v3228_v19 = vld [vmem:[%s4121_s7 + $0x4] ss:$0 sm:$0xff] }
 0x711   : > { %v1633_v20 = vpop.xlane.xlu0 %1632 }
 0x712   : > { %v1634_v21 = vmul.f32 %v1633_v20, %v3531_v8  ;;  %v3229_v20 = vld [vmem:[%s4121_s7 + $0x5] ss:$0 sm:$0xff]  ;;  %s3305_s7 = scalar_lea.hbm %s3304_s6, 1 }
 0x713   : > { %p3306_p11 = scmp.ne.s32.totalorder %s3304_s6, %s3305_s7  ;;  %p3311_p1 = scmp.lt.s32.totalorder %s3309_s25, %s3305_s7 }
 0x714   : > { %v1635_v22 = vsub.f32 %v1628_v17, %v1634_v21 }
 0x715   : > { %p3307_p12 = pnand %p3306_p11, %p3512_p5  ;;  %p3312_p2 = por %p3311_p1, %p3310_p0 }
 0x716   : > { %v1636_v23 = vmul.f32 %v1635_v22, %v1635_v22 }
 0x717   : > { %p3308_p13 = pneg %p3307_p12 }
 0x718   : > { %v1637_v24 = vsel %vm736_vm0, %v1636_v23, 0.0 }
 0x719   : > { %1638 = vadd.xlane.f32.xlu1 %v1637_v24  ;;  %p3313_p3 = pnand %p3312_p2, %p3308_p13 }
 0x78c   : > { %v1639_v33 = vpop.xlane.xlu1 %1638 }
 0x78d   : > { %v1640_v37 = vmul.f32 %v1639_v33, %v3531_v8 }
 0x78f   : > { %v1641_v44 = vadd.f32 1e-12, %v1640_v37 }
 0x791   : > { %3265 = vrsqrt.f32 %v1641_v44  ;;  %vm1648_vm12 = vweird.f32 %v1641_v44 }
 0x797   : > { %v3266_v43 = vpop.eup %3265 }
 0x798   : > { %v1643_v45 = vmul.f32 %v3266_v43, %v1641_v44  ;;  %vm1649_vm11 = vweird.f32 %v3266_v43 }
 0x799   : > { %vm1650_vm13 = vmor %vm1648_vm12, %vm1649_vm11 }
 0x79a   : > { %v1644_v46 = vmul.f32 %v3266_v43, %v1643_v45 }
 0x79c   : > { %v1645_v47 = vmul.f32 0.5, %v1644_v46 }
 0x79e   : > { %v1646_v48 = vsub.f32 1.5, %v1645_v47 }
 0x7a0   : > { %v1647_v49 = vmul.f32 %v3266_v43, %v1646_v48 }
 0x7a2   : > { %v1651_v51 = vsel %vm1650_vm13, %v3266_v43, %v1647_v49  ;;  %v3230_v49 = vld [vmem:[%s4065_s9 + $0x6] ss:$0 sm:$0xff] }
 0x7a3   : > { %v1652_v53 = vmul.f32 %v1651_v51, %v1635_v22 }
 0x7a5   : > { %v1656_v54 = vmul.f32 %v3220_v50, %v1652_v53  ;;  %v3231_v50 = vld [vmem:[%s4065_s9 + $0x7] ss:$0 sm:$0xff] }
 0x7a7   : > { %v3831_v55 = vadd.f32 %v3221_v52, %v1656_v54 }
 0x7a9   : > { %2856 = vst.msk [vmem:[%s3594_s3 + $0x8] sm:$0xff] %vm736_vm0, %v3831_v55  ;;  %v1663_v56 = vpack.c.bf16 %v3831_v55, %v3831_v55 }
 0x7ab   : > { %2885 = vmatmul.msk.bf16.vlgmr.msra.gmra.mxu2 %vm736_vm0, %v1663_v56  ;;  %2894 = vmatmul.msk.bf16.vlgmr.msra.gmra.mxu3 %vm736_vm0, %v1663_v56 }
 0x7ac   : > { %2903 = vmatmul.msk.bf16.vlgmr.msrb.gmra.mxu0 %vm736_vm0, %v1663_v56  ;;  %2912 = vmatmul.msk.bf16.vlgmr.msrb.gmra.mxu1 %vm736_vm0, %v1663_v56 }
 0x7ad   : > { %1987 = vmatpush.bf16.msra.mxu2 %v3145_v57  ;;  %2012 = vmatpush.bf16.msra.mxu3 %v3147_v58  ;;  %v3232_v58 = vld [vmem:[%s4065_s9 + $0x4] ss:$0 sm:$0xff] }
 0x7ae   : > { %2037 = vmatpush.bf16.msrb.mxu0 %v3149_v59  ;;  %2062 = vmatpush.bf16.msrb.mxu1 %v3151_v60  ;;  %v3233_v59 = vld [vmem:[%s4065_s9 + $0x5] ss:$0 sm:$0xff] }
 0x7b1   : > { %1988 = vmatpush.bf16.msra.mxu2 %v3144_v61  ;;  %2013 = vmatpush.bf16.msra.mxu3 %v3146_v62 }
 0x7b2   : > { %2038 = vmatpush.bf16.msrb.mxu0 %v3148_v63  ;;  %2063 = vmatpush.bf16.msrb.mxu1 %v3150_v0 }
 0x7bb   : > { %2941 = vmatmul.msk.bf16.vlgmr.msrb.gmra.mxu2 %vm736_vm0, %v1663_v56  ;;  %2950 = vmatmul.msk.bf16.vlgmr.msrb.gmra.mxu3 %vm736_vm0, %v1663_v56 }
 0x7bc   : > { %2959 = vmatmul.msk.bf16.vlgmr.msra.gmra.mxu0 %vm736_vm0, %v1663_v56  ;;  %2968 = vmatmul.msk.bf16.vlgmr.msra.gmra.mxu1 %vm736_vm0, %v1663_v56 }
 0x7cb   : > { %2997 = vmatmul.msk.bf16.vlgmr.msra.gmra.mxu2 %vm736_vm0, %v1663_v56  ;;  %3006 = vmatmul.msk.bf16.vlgmr.msra.gmra.mxu3 %vm736_vm0, %v1663_v56 }
 0x7cc   : > { %3015 = vmatmul.msk.bf16.vlgmr.msrb.gmra.mxu0 %vm736_vm0, %v1663_v56  ;;  %3024 = vmatmul.msk.bf16.vlgmr.msrb.gmra.mxu1 %vm736_vm0, %v1663_v56 }
 0x829   : > { %v1772_v1 = vpop.f32.mrf.mxu0  ;;  %v1797_v2 = vpop.f32.mrf.mxu1 }
 0x82a   : > { %v1773_v21 = vadd.f32 %v3222_v13, %v1772_v1  ;;  %v1798_v22 = vadd.f32 %v3223_v14, %v1797_v2 }
 0x82c   : > { %v2071_v33 = vmul.f32 0.35355338, %v1773_v21  ;;  %v2072_v34 = vmul.f32 0.35355338, %v1798_v22 }
 0x82e   : > { %v1722_v4 = vpop.f32.mrf.mxu2  ;;  %v1747_v5 = vpop.f32.mrf.mxu3  ;;  %v2075_v42 = vpack.c.bf16 %v2071_v33, %v2071_v33  ;;  %v2076_v43 = vpack.c.bf16 %v2072_v34, %v2072_v34 }
 0x82f   : > { %v1723_v35 = vadd.f32 %v3224_v25, %v1722_v4  ;;  %v1748_v36 = vadd.f32 %v3225_v26, %v1747_v5 }
 0x831   : > { %v1774_v6 = vpop.f32.mrf.mxu0  ;;  %v1799_v7 = vpop.f32.mrf.mxu1  ;;  %v2069_v45 = vmul.f32 0.35355338, %v1723_v35  ;;  %v2070_v46 = vmul.f32 0.35355338, %v1748_v36 }
 0x833   : > { %v2073_v51 = vpack.c.bf16 %v2069_v45, %v2069_v45  ;;  %v2074_v52 = vpack.c.bf16 %v2070_v46, %v2070_v46 }
 0x836   : > { %v1724_v9 = vpop.f32.mrf.mxu2  ;;  %v1749_v10 = vpop.f32.mrf.mxu3 }
 0x839   : > { %v1906_v15 = vpop.f32.mrf.mxu0  ;;  %v1931_v16 = vpop.f32.mrf.mxu1 }
 0x83a   : > { %v1907_v17 = vadd.f32 %v3226_v11, %v1906_v15  ;;  %v1932_v18 = vadd.f32 %v3227_v12, %v1931_v16 }
 0x83c   : > { %v2079_v23 = vpack.c.bf16 %v1907_v17, %v1907_v17  ;;  %v2080_v24 = vpack.c.bf16 %v1932_v18, %v1932_v18 }
 0x83e   : > { %v2123_v27 = vsel %vm1193_vm5, %v2079_v23, 0  ;;  %v2142_v28 = vsel %vm1193_vm5, %v2080_v24, 0  ;;  %v1856_v29 = vpop.f32.mrf.mxu2  ;;  %v1881_v30 = vpop.f32.mrf.mxu3 }
 0x83f   : > { %v1857_v31 = vadd.f32 %v3228_v19, %v1856_v29  ;;  %v1882_v32 = vadd.f32 %v3229_v20, %v1881_v30  ;;  %2132 = vmatpush.bf16.xpose.msra.mxu0 %v2123_v27  ;;  %2151 = vmatpush.bf16.xpose.msra.mxu1 %v2142_v28 }
 0x841   : > { %v2077_v37 = vpack.c.bf16 %v1857_v31, %v1857_v31  ;;  %v2078_v38 = vpack.c.bf16 %v1882_v32, %v1882_v32  ;;  %v1908_v39 = vpop.f32.mrf.mxu0  ;;  %v1933_v40 = vpop.f32.mrf.mxu1 }
 0x843   : > { %v2085_v44 = vsel %vm1193_vm5, %v2077_v37, 0  ;;  %v2104_v41 = vsel %vm1193_vm5, %v2078_v38, 0 }
 0x844   : > { %2094 = vmatpush.bf16.xpose.msrb.mxu2 %v2085_v44  ;;  %2113 = vmatpush.bf16.xpose.msrb.mxu3 %v2104_v41 }
 0x846   : > { %3027 = vmatmul.msk.bf16.vlgmr.msra.gmra.mxu0 %vm1193_vm5, %v2075_v42  ;;  %3028 = vmatmul.msk.bf16.vlgmr.msra.gmra.mxu1 %vm1193_vm5, %v2076_v43  ;;  %v1858_v47 = vpop.f32.mrf.mxu2  ;;  %v1883_v48 = vpop.f32.mrf.mxu3 }
 0x849   : > { %v2040_v53 = vpop.f32.mrf.mxu0  ;;  %v2065_v54 = vpop.f32.mrf.mxu1 }
 0x84a   : > { %v2041_v56 = vadd.f32 %v3230_v49, %v2040_v53  ;;  %v2066_v57 = vadd.f32 %v3231_v50, %v2065_v54 }
 0x84b   : > { %3025 = vmatmul.msk.bf16.vlgmr.msrb.gmra.mxu2 %vm1193_vm5, %v2073_v51  ;;  %3026 = vmatmul.msk.bf16.vlgmr.msrb.gmra.mxu3 %vm1193_vm5, %v2074_v52 }
 0x84c   : > { %v2207_v60 = vpack.c.bf16 %v2041_v56, %v2041_v56  ;;  %v2208_v61 = vpack.c.bf16 %v2066_v57, %v2066_v57 }
 0x84e   : > { %v2251_v62 = vsel %vm1325_vm6, %v2207_v60, 0  ;;  %v2270_v63 = vsel %vm1325_vm6, %v2208_v61, 0  ;;  %v1990_v0 = vpop.f32.mrf.mxu2  ;;  %v2015_v1 = vpop.f32.mrf.mxu3 }
 0x84f   : > { %v1991_v2 = vadd.f32 %v3232_v58, %v1990_v0  ;;  %v2016_v4 = vadd.f32 %v3233_v59, %v2015_v1  ;;  %2260 = vmatpush.bf16.msrb.mxu0 %v2251_v62  ;;  %2279 = vmatpush.bf16.msrb.mxu1 %v2270_v63 }
 0x851   : > { %v2205_v5 = vpack.c.bf16 %v1991_v2, %v1991_v2  ;;  %v2206_v6 = vpack.c.bf16 %v2016_v4, %v2016_v4  ;;  %v2042_v7 = vpop.f32.mrf.mxu0  ;;  %v2067_v9 = vpop.f32.mrf.mxu1  ;;  %v3035_v2 = vld [vmem:[%s4066_s10 + $0x18] sm:$0xf] }
 0x852   : > { %v2336_v4 = vsel %vm1325_vm6, %v3035_v2, 0  ;;  %v3156_v2 = vld [vmem:[%s4072_s16 + $0x30] sm:$0xff] }
 0x853   : > { %v2213_v10 = vsel %vm1325_vm6, %v2205_v5, 0  ;;  %v2232_v11 = vsel %vm1325_vm6, %v2206_v6, 0  ;;  %2345 = vmatpush.bf16.msra.mxu0 %v2336_v4  ;;  %v3033_v5 = vld [vmem:[%s4066_s10 + $0x10] sm:$0xf]  ;;  %v3034_v6 = vld [vmem:[%s4066_s10 + $0x14] sm:$0xf] }
 0x854   : > { %2222 = vmatpush.bf16.msra.mxu2 %v2213_v10  ;;  %2241 = vmatpush.bf16.msra.mxu3 %v2232_v11  ;;  %v2298_v7 = vsel %vm1325_vm6, %v3033_v5, 0  ;;  %v2317_v9 = vsel %vm1325_vm6, %v3034_v6, 0  ;;  %v3036_v10 = vld [vmem:[%s4066_s10 + $0x1c] sm:$0xf]  ;;  %v3155_v4 = vld [vmem:[%s4072_s16 + $0x28] sm:$0xff]  ;;  %v3154_v5 = vld [vmem:[%s4072_s16 + $0x20] sm:$0xff] }
 0x855   : > { %v2355_v11 = vsel %vm1325_vm6, %v3036_v10, 0  ;;  %v3237_v6 = vld [vmem:[%s4071_s15 + $0x1] ss:$0 sm:$0xff] }
 0x856   : > { %v1992_v12 = vpop.f32.mrf.mxu2  ;;  %v2017_v13 = vpop.f32.mrf.mxu3  ;;  %2364 = vmatpush.bf16.msra.mxu1 %v2355_v11 }
 0x858   : > { %2307 = vmatpush.bf16.msrb.mxu2 %v2298_v7  ;;  %2326 = vmatpush.bf16.msrb.mxu3 %v2317_v9 }
 0x8c3   : > { %v2134_v14 = vpop.f32.mrf.mxu0  ;;  %v2153_v15 = vpop.f32.mrf.mxu1 }
 0x8c4   : > { %v2135_v16 = vadd.f32 %v2134_v14, %v3691_v3  ;;  %v2154_v26 = vadd.f32 %v2153_v15, %v3691_v3 }
 0x8c6   : > { %v2163_v17 = vsel %vm1193_vm5, %v2135_v16, -inf  ;;  %v2166_v29 = vsel %vm1193_vm5, %v2154_v26, -inf }
 0x8c7   : > { %2164 = vmax.xlane.f32.xlu1 %v2163_v17 }
 0x8cb   : > { %v2136_v18 = vpop.f32.mrf.mxu0  ;;  %v2155_v19 = vpop.f32.mrf.mxu1 }
 0x8ce   : > { %v2096_v20 = vpop.f32.mrf.mxu2  ;;  %v2115_v21 = vpop.f32.mrf.mxu3 }
 0x8cf   : > { %v2097_v22 = vadd.f32 %v2096_v20, %v3691_v3  ;;  %v2116_v23 = vadd.f32 %v2115_v21, %v3691_v3 }
 0x8d1   : > { %v2160_v24 = vsel %vm1193_vm5, %v2116_v23, -inf  ;;  %v2157_v25 = vsel %vm1193_vm5, %v2097_v22, -inf }
 0x8d2   : > { %2161 = vmax.xlane.f32.xlu0 %v2160_v24  ;;  %2158 = vmax.xlane.f32.xlu2 %v2157_v25 }
 0x8d6   : > { %v2098_v27 = vpop.f32.mrf.mxu2  ;;  %v2117_v28 = vpop.f32.mrf.mxu3 }
 0x8da   : > { %2167 = vmax.xlane.f32.xlu2 %v2166_v29 }
 0x93a   : > { %v2165_v30 = vpop.xlane.xlu1 %2164 }
 0x93b   : > { %v2171_v31 = vsub.f32 %v2135_v16, %v2165_v30 }
 0x93d   : > { %v2177_v32 = vmul.f32 1.442695, %v2171_v31 }
 0x93f   : > { %3267 = vpow2.f32 %v2177_v32 }
 0x945   : > { %v3268_v33 = vpop.eup %3267  ;;  %v2162_v34 = vpop.xlane.xlu0 %2161 }
 0x946   : > { %v2159_v35 = vpop.xlane.xlu2 %2158  ;;  %v2170_v36 = vsub.f32 %v2116_v23, %v2162_v34  ;;  %v2187_v38 = vsel %vm1193_vm5, %v3268_v33, 0.0 }
 0x947   : > { %v2169_v37 = vsub.f32 %v2097_v22, %v2159_v35  ;;  %2188 = vadd.xlane.f32.xlu2 %v2187_v38  ;;  %v3234_v35 = vld [vmem:[%s4067_s11 + $0x1] ss:$0 sm:$0xff] }
 0x948   : > { %v2175_v39 = vmul.f32 1.442695, %v2170_v36 }
 0x949   : > { %v2173_v40 = vmul.f32 1.442695, %v2169_v37 }
 0x94a   : > { %3269 = vpow2.f32 %v2175_v39 }
 0x94b   : > { %3271 = vpow2.f32 %v2173_v40 }
 0x94e   : > { %v2168_v3 = vpop.xlane.xlu2 %2167 }
 0x94f   : > { %v2172_v44 = vsub.f32 %v2154_v26, %v2168_v3 }
 0x950   : > { %v3270_v41 = vpop.eup %3269 }
 0x951   : > { %v2179_v42 = vmul.f32 1.442695, %v2172_v44  ;;  %v3272_v43 = vpop.eup %3271  ;;  %v2184_v45 = vsel %vm1193_vm5, %v3270_v41, 0.0 }
 0x952   : > { %2185 = vadd.xlane.f32.xlu1 %v2184_v45  ;;  %v2181_v46 = vsel %vm1193_vm5, %v3272_v43, 0.0 }
 0x953   : > { %3273 = vpow2.f32 %v2179_v42  ;;  %2182 = vadd.xlane.f32.xlu0 %v2181_v46 }
 0x959   : > { %v3274_v47 = vpop.eup %3273 }
 0x95a   : > { %v2190_v48 = vsel %vm1193_vm5, %v3274_v47, 0.0 }
 0x95b   : > { %2191 = vadd.xlane.f32.xlu0 %v2190_v48 }
 0x9ba   : > { %v2189_v49 = vpop.xlane.xlu2 %2188 }
 0x9bb   : > { %3275 = vrcp.f32 %v2189_v49 }
 0x9c1   : > { %v3276_v50 = vpop.eup %3275 }
 0x9c2   : > { %v2199_v51 = vmul.f32 %v3276_v50, %v3268_v33 }
 0x9c4   : > { %v2203_v52 = vpack.c.bf16 %v2199_v51, %v2199_v51 }
 0x9c5   : > { %v2186_v53 = vpop.xlane.xlu1 %2185 }
 0x9c6   : > { %3277 = vrcp.f32 %v2186_v53  ;;  %v2183_v54 = vpop.xlane.xlu0 %2182  ;;  %3031 = vmatmul.msk.bf16.vlgmr.msrb.gmra.mxu0 %vm1193_vm5, %v2203_v52 }
 0x9c7   : > { %3279 = vrcp.f32 %v2183_v54 }
 0x9cc   : > { %v3278_v56 = vpop.eup %3277 }
 0x9cd   : > { %v3280_v57 = vpop.eup %3279  ;;  %v2198_v58 = vmul.f32 %v3278_v56, %v3270_v41 }
 0x9ce   : > { %v2197_v59 = vmul.f32 %v3280_v57, %v3272_v43  ;;  %v2192_v60 = vpop.xlane.xlu0 %2191 }
 0x9cf   : > { %v2202_v61 = vpack.c.bf16 %v2198_v58, %v2198_v58  ;;  %3281 = vrcp.f32 %v2192_v60  ;;  %v3235_v58 = vld [vmem:[%s4068_s12 + $0x1] ss:$0 sm:$0xff] }
 0x9d0   : > { %v2201_v62 = vpack.c.bf16 %v2197_v59, %v2197_v59  ;;  %v3236_v60 = vld [vmem:[%s4069_s13 + $0x1] ss:$0 sm:$0xff] }
 0x9d1   : > { %3030 = vmatmul.msk.bf16.vlgmr.msra.gmra.mxu3 %vm1193_vm5, %v2202_v61 }
 0x9d2   : > { %3029 = vmatmul.msk.bf16.vlgmr.msra.gmra.mxu2 %vm1193_vm5, %v2201_v62 }
 0x9d5   : > { %v3282_v63 = vpop.eup %3281 }
 0x9d6   : > { %v2200_v0 = vmul.f32 %v3282_v63, %v3274_v47  ;;  %v3153_v47 = vld [vmem:[%s4070_s14 + $0x18] sm:$0xff] }
 0x9d7   : > { %2450 = vmatpush.bf16.msra.mxu2 %v3153_v47 }
 0x9d8   : > { %v2204_v1 = vpack.c.bf16 %v2200_v0, %v2200_v0 }
 0x9da   : > { %3032 = vmatmul.msk.bf16.vlgmr.msrb.gmra.mxu1 %vm1193_vm5, %v2204_v1  ;;  %v3157_v1 = vld [vmem:[%s4072_s16 + $0x38] sm:$0xff] }
 0x9db   : > { %2512 = vmatpush.bf16.msra.mxu3 %v3157_v1 }
 0x9df   : > { %2513 = vmatpush.bf16.msra.mxu3 %v3156_v2 }
 0x9e3   : > { %2514 = vmatpush.bf16.msra.mxu3 %v3155_v4 }
 0x9e7   : > { %2515 = vmatpush.bf16.msra.mxu3 %v3154_v5 }
 0xa43   : > { %v2262_v12 = vpop.f32.mrf.mxu0 }
 0xa44   : > { %v2287_v13 = vpack.c.bf16 %v2262_v12, %v2262_v12 }
 0xa46   : > { %3039 = vmatmul.msk.bf16.vlgmr.msra.gmra.mxu0 %vm1193_vm5, %v2287_v13 }
 0xa4b   : > { %v2264_v14 = vpop.f32.mrf.mxu0 }
 0xa54   : > { %v2243_v15 = vpop.f32.mrf.mxu3 }
 0xa55   : > { %v2224_v16 = vpop.f32.mrf.mxu2  ;;  %v2286_v17 = vpack.c.bf16 %v2243_v15, %v2243_v15 }
 0xa56   : > { %v2285_v18 = vpack.c.bf16 %v2224_v16, %v2224_v16 }
 0xa57   : > { %v2281_v19 = vpop.f32.mrf.mxu1  ;;  %3038 = vmatmul.msk.bf16.vlgmr.msrb.gmra.mxu3 %vm1193_vm5, %v2286_v17 }
 0xa58   : > { %v2288_v20 = vpack.c.bf16 %v2281_v19, %v2281_v19  ;;  %3037 = vmatmul.msk.bf16.vlgmr.msrb.gmra.mxu2 %vm1193_vm5, %v2285_v18 }
 0xa5a   : > { %3040 = vmatmul.msk.bf16.vlgmr.msra.gmra.mxu1 %vm1193_vm5, %v2288_v20  ;;  %vm2592_vm5 = vcmask 16384  }
 0xa5c   : > { %v2245_v21 = vpop.f32.mrf.mxu3 }
 0xa5d   : > { %v2226_v22 = vpop.f32.mrf.mxu2  ;;  %v3238_v21 = vld [vmem:[%s4073_s17 + $0x1] ss:$0 sm:$0xff] }
 0xa5f   : > { %v2283_v23 = vpop.f32.mrf.mxu1 }
 0xac3   : > { %v2347_v24 = vpop.f32.mrf.mxu0 }
 0xac4   : > { %v2373_v32 = vsel %vm736_vm0, %v2347_v24, 0.0 }
 0xacb   : > { %v2349_v25 = vpop.f32.mrf.mxu0 }
 0xad7   : > { %v2366_v26 = vpop.f32.mrf.mxu1 }
 0xad8   : > { %v2375_v36 = vsel %vm736_vm0, %v2366_v26, 0.0 }
 0xada   : > { %v2328_v27 = vpop.f32.mrf.mxu3 }
 0xadb   : > { %v2309_v28 = vpop.f32.mrf.mxu2  ;;  %v2371_v29 = vsel %vm736_vm0, %v2328_v27, 0.0 }
 0xadc   : > { %v2370_v30 = vsel %vm736_vm0, %v2309_v28, 0.0 }
 0xadd   : > { %v2372_v31 = vadd.f32 %v2371_v29, %v2370_v30 }
 0xadf   : > { %v2374_v33 = vadd.f32 %v2373_v32, %v2372_v31  ;;  %v2368_v34 = vpop.f32.mrf.mxu1  ;;  %v3159_v32 = vld [vmem:[%s4076_s20 + $0x8] sm:$0xff] }
 0xae0   : > { %2585 = vmatpush.bf16.msrb.mxu0 %v3159_v32 }
 0xae1   : > { %v2376_v37 = vadd.f32 %v2375_v36, %v2374_v33  ;;  %v3158_v33 = vld [vmem:[%s4076_s20] sm:$0xff] }
 0xae2   : > { %v2330_v38 = vpop.f32.mrf.mxu3 }
 0xae3   : > { %v2311_v39 = vpop.f32.mrf.mxu2  ;;  %v2382_v40 = vadd.f32 %v3234_v35, %v2376_v37 }
 0xae4   : > { %2586 = vmatpush.bf16.msrb.mxu0 %v3158_v33 }
 0xae5   : > { %v2383_v3 = vadd.f32 %v2382_v40, %v3831_v55  ;;  %v3152_v55 = vld [vmem:[%s4070_s14 + $0x10] sm:$0xff] }
 0xae6   : > { %2451 = vmatpush.bf16.msra.mxu2 %v3152_v55  ;;  %v2563_v55 = vld [vmem:[%s4124_s21] sm:$0x1] }
 0xae7   : > { %v2388_v44 = vsel %vm736_vm0, %v2383_v3, 0.0 }
 0xae8   : > { %2389 = vadd.xlane.f32.xlu1 %v2388_v44 }
 0xb5b   : > { %v2390_v41 = vpop.xlane.xlu1 %2389 }
 0xb5c   : > { %v2391_v42 = vmul.f32 %v2390_v41, %v3531_v8  ;;  %v3239_v41 = vld [vmem:[%s4074_s18 + $0x1] ss:$0 sm:$0xff] }
 0xb5e   : > { %v2392_v43 = vsub.f32 %v2383_v3, %v2391_v42 }
 0xb60   : > { %v2393_v45 = vmul.f32 %v2392_v43, %v2392_v43 }
 0xb62   : > { %v2394_v46 = vsel %vm736_vm0, %v2393_v45, 0.0 }
 0xb63   : > { %2395 = vadd.xlane.f32.xlu2 %v2394_v46 }
 0xbd6   : > { %v2396_v48 = vpop.xlane.xlu2 %2395 }
 0xbd7   : > { %v2397_v49 = vmul.f32 %v2396_v48, %v3531_v8 }
 0xbd9   : > { %v2398_v50 = vadd.f32 1e-12, %v2397_v49 }
 0xbdb   : > { %3283 = vrsqrt.f32 %v2398_v50  ;;  %vm2405_vm15 = vweird.f32 %v2398_v50 }
 0xbe1   : > { %v3284_v51 = vpop.eup %3283 }
 0xbe2   : > { %v2400_v52 = vmul.f32 %v3284_v51, %v2398_v50  ;;  %vm2406_vm14 = vweird.f32 %v3284_v51 }
 0xbe3   : > { %vm2407_vm1 = vmor %vm2405_vm15, %vm2406_vm14 }
 0xbe4   : > { %v2401_v53 = vmul.f32 %v3284_v51, %v2400_v52 }
 0xbe6   : > { %v2402_v54 = vmul.f32 0.5, %v2401_v53 }
 0xbe8   : > { %v2403_v56 = vsub.f32 1.5, %v2402_v54 }
 0xbea   : > { %v2404_v57 = vmul.f32 %v3284_v51, %v2403_v56 }
 0xbec   : > { %v2408_v59 = vsel %vm2407_vm1, %v3284_v51, %v2404_v57 }
 0xbed   : > { %v2409_v61 = vmul.f32 %v2408_v59, %v2392_v43 }
 0xbef   : > { %v2413_v62 = vmul.f32 %v3235_v58, %v2409_v61 }
 0xbf1   : > { %v2417_v63 = vadd.f32 %v3236_v60, %v2413_v62 }
 0xbf3   : > { %v2418_v0 = vpack.c.bf16 %v2417_v63, %v2417_v63 }
 0xbf5   : > { %3057 = vmatmul.msk.bf16.vlgmr.msra.gmra.mxu2 %vm736_vm0, %v2418_v0 }
 0xc78   : > { %v2453_v7 = vpop.f32.mrf.mxu2 }
 0xc79   : > { %v2454_v9 = vadd.f32 %v3237_v6, %v2453_v7 }
 0xc7b   : > { %v2458_v10 = vmul.f32 0.044715, %v2454_v9  ;;  %v2457_v17 = vmul.f32 0.5, %v2454_v9 }
 0xc7d   : > { %v2459_v11 = vmul.f32 %v2458_v10, %v2454_v9 }
 0xc7f   : > { %v2460_v12 = vmul.f32 %v2459_v11, %v2454_v9 }
 0xc80   : > { %v2455_v13 = vpop.f32.mrf.mxu2 }
 0xc81   : > { %v2461_v14 = vadd.f32 %v2460_v12, %v2454_v9 }
 0xc83   : > { %v2462_v15 = vmul.f32 0.7978846, %v2461_v14 }
 0xc85   : > { %3285 = vtanh.f32 %v2462_v15 }
 0xc8b   : > { %v3286_v16 = vpop.eup %3285 }
 0xc8c   : > { %v2464_v18 = vadd.f32 1.0, %v3286_v16 }
 0xc8e   : > { %v2465_v19 = vmul.f32 %v2464_v18, %v2457_v17 }
 0xc90   : > { %v2466_v20 = vpack.c.bf16 %v2465_v19, %v2465_v19 }
 0xc92   : > { %3083 = vmatmul.msk.bf16.vlgmr.msra.gmra.mxu3 %vm1611_vm10, %v2466_v20 }
 0xd15   : > { %v2517_v22 = vpop.f32.mrf.mxu3 }
 0xd16   : > { %v2518_v23 = vadd.f32 %v3238_v21, %v2517_v22 }
 0xd18   : > { %v2521_v24 = vadd.f32 %v2518_v23, %v2417_v63 }
 0xd1a   : > { %v2526_v25 = vsel %vm736_vm0, %v2521_v24, 0.0 }
 0xd1b   : > { %2527 = vadd.xlane.f32.xlu0 %v2526_v25 }
 0xd1d   : > { %v2519_v26 = vpop.f32.mrf.mxu3 }
 0xd8e   : > { %v2528_v27 = vpop.xlane.xlu0 %2527 }
 0xd8f   : > { %v2529_v28 = vmul.f32 %v2528_v27, %v3531_v8 }
 0xd91   : > { %v2530_v29 = vsub.f32 %v2521_v24, %v2529_v28 }
 0xd93   : > { %v2531_v30 = vmul.f32 %v2530_v29, %v2530_v29 }
 0xd95   : > { %v2532_v31 = vsel %vm736_vm0, %v2531_v30, 0.0 }
 0xd96   : > { %2533 = vadd.xlane.f32.xlu1 %v2532_v31 }
 0xe09   : > { %v2534_v34 = vpop.xlane.xlu1 %2533 }
 0xe0a   : > { %v2535_v35 = vmul.f32 %v2534_v34, %v3531_v8  ;;  %v3240_v8 = vld [vmem:[%s4075_s19 + $0x1] ss:$0 sm:$0xff] }
 0xe0c   : > { %v2536_v36 = vadd.f32 1e-12, %v2535_v35 }
 0xe0e   : > { %3287 = vrsqrt.f32 %v2536_v36  ;;  %vm2543_vm3 = vweird.f32 %v2536_v36 }
 0xe14   : > { %v3288_v37 = vpop.eup %3287 }
 0xe15   : > { %v2538_v38 = vmul.f32 %v3288_v37, %v2536_v36  ;;  %vm2544_vm2 = vweird.f32 %v3288_v37 }
 0xe16   : > { %vm2545_vm4 = vmor %vm2543_vm3, %vm2544_vm2 }
 0xe17   : > { %v2539_v39 = vmul.f32 %v3288_v37, %v2538_v38 }
 0xe19   : > { %v2540_v40 = vmul.f32 0.5, %v2539_v39 }
 0xe1b   : > { %v2541_v3 = vsub.f32 1.5, %v2540_v40 }
 0xe1d   : > { %v2542_v44 = vmul.f32 %v3288_v37, %v2541_v3 }
 0xe1f   : > { %v2546_v42 = vsel %vm2545_vm4, %v3288_v37, %v2542_v44 }
 0xe20   : > { %v2547_v43 = vmul.f32 %v2546_v42, %v2530_v29 }
 0xe22   : > { %v2551_v45 = vmul.f32 %v3239_v41, %v2547_v43 }
 0xe24   : > { %v2555_v46 = vadd.f32 %v3240_v8, %v2551_v45 }
 0xe26   : > { %3086 = vst.msk [vmem:[%s3594_s3 + $0x10] sm:$0xff] %vm736_vm0, %v2555_v46  ;;  %v2558_v47 = vpack.c.bf16 %v2555_v46, %v2555_v46  ;;  %s2600_s3 = scalar_lea.sflag [#allocation3], %s718_s26 }
 0xe28   : > { %3095 = vmatmul.msk.bf16.vlgmr.msrb.gmra.mxu0 %vm736_vm0, %v2558_v47 }
 0xea5   : > { %v2588_v48 = vpop.f32.mrf.mxu0 }
 0xea6   : > { %v2589_v49 = vadd.f32 %v2588_v48, %v2563_v55 }
 0xea8   : > { %2593 = vst.msk [vmem:[%s719_s27] sm:$0x1] %vm2592_vm5, %v2589_v49 }
 0xea9   : > { %3316 = shalt.err (!%p3313_p3)
}
 0xeaa   : > { %3161 = dma.vmem_to_hbm [thread:$0]  (%p3512_p5), %s2614_s24, 16, %s2616_s1, %s2600_s3  }
 0xead   : > { %v2590_v50 = vpop.f32.mrf.mxu0 }
 0xeae PF: > { %s4126_s26 = sld [smem:[#allocation7_spill]] }
 0xeaf   : > { %s4127_s22 = sld [smem:[#allocation5_spill]] }
 0xeb4   : > { %p3167_p4 = scmp.ge.s32.totalorder %s4126_s26, 2 }
 0xeb5   : > { %s2635_s27 = sand.u32 1, %s4127_s22  }
 0xeb6   : > { %p3164_p7 = pnand %p3167_p4, %p3516_p6  ;;  %s2636_s5 = scalar_lea.sflag [#allocation3], %s2635_s27 }
 0xeb8   : > { %p3165_p8 = pneg %p3164_p7 }
 0xeba   : > { %3334 = dma.done.wait (%p3165_p8), %s2636_s5, 16  }
 0xebb   : > { %3336 = vsyncadd (%p3165_p8), %s2636_s5, 4294967280  ;;  %s4129_s25 = sld [smem:[#allocation8_spill]]  ;;  %s4132_s4 = smov %s3343_s30 }
 0xebc   : > { %s4130_s7 = sld [smem:[#allocation6_spill]] }
 0xebd   : > { %s4131_s24 = sld [smem:[#allocation9_spill]] }
 0xec1   : > { %p34_p9 = scmp.ge.s32.totalorder %s4129_s25, 4  }
 0xec2   : > { %s4133_s30 = smov %s4130_s7 }
 0xec3   :  { %36 = sbr.rel (!%p34_p9) target bundleno = 14 (0xe), region = 176 }
 0xec8   :  { %2641 = vsyncpa [#allocation3], 1 }
 0xec9   :  { %2643 = vsyncpa [#allocation3 + $0x1], 1 }

</bundles_post_ra>
